<compile_context>
chip_gen: v6e
topology: v6e:2x2x1
jax: 0.10.0
libtpu: 0.0.40
codegen_flags: <defaults>
</compile_context>

<pallas_src>
import functools

import jax
import jax.numpy as jnp
from jax.experimental import pallas as pl
from jax.experimental.pallas import tpu as pltpu


def lstm_mlp_kernel(x_ref, wih_ref, whh_ref, b_ref,
                    w2_ref, b2_ref, w3_ref, b3_ref, w4_ref, b4_ref,
                    out_ref, *, t_steps):
    B = out_ref.shape[0]
    H = whh_ref.shape[0]
    O = b4_ref.shape[1]
    prec = jax.lax.Precision.DEFAULT  # single bf16 MXU pass, f32 accumulation

    # Hoisted input projection: one (B*T, D) @ (D, 4H) matmul + bias, entirely
    # off the serial h->h dependency chain.  Rows are batch-major (b*T + t),
    # so the wrapper never had to transpose x.
    x_proj = (jnp.dot(x_ref[...], wih_ref[...],
                      preferred_element_type=jnp.float32, precision=prec)
              + b_ref[...])                                   # (B*T, 4H)
    # No-op relayout: (B*T, 4H) -> (B, T, 4H); row b*T + t == vreg b, sublane t.
    x_proj = x_proj.reshape(B, t_steps, 4 * H)

    whh = whh_ref[...]                                        # (H, 4H), stays in vregs
    h = jnp.zeros((B, H), jnp.float32)
    c = jnp.zeros((B, H), jnp.float32)

    # NOTE: whh could additionally be latched in the MXU weight registers
    # across all T steps via pltpu.matmul_push_rhs/matmul_acc_lhs/matmul_pop;
    # skipped here to keep the lowering portable across v5e/v6e/v7x.
    # Statically unrolled recurrence (T=8); h/c are plain vreg loop-carries.
    for t in range(t_steps):
        # x_proj slice is independent of h -> scheduler hoists it off the chain.
        gates = x_proj[:, t, :] + jnp.dot(
            h, whh, preferred_element_type=jnp.float32, precision=prec)  # (B, 4H)
        # i/f/o weight columns were pre-scaled by 0.5 in the wrapper, so a
        # single full-vreg tanh (one EUP pass) yields all four activations:
        #   sigmoid(z) = 0.5*tanh(z/2) + 0.5   (i, f, o lanes; z/2 is in `gates`)
        #   tanh(z)                            (g lanes, unscaled)
        th = jnp.tanh(gates)
        sg = 0.5 * th + 0.5                                   # VPU fixup (idle slot)
        i = sg[:, 0 * H:1 * H]
        f = sg[:, 1 * H:2 * H]
        g = th[:, 2 * H:3 * H]
        o = sg[:, 3 * H:4 * H]
        c = f * c + i * g
        h = o * jnp.tanh(c)

    # MLP head on the (sigmoid of the) final hidden state; runs once, off-chain.
    h_sig = jax.nn.sigmoid(h)
    y = jax.nn.sigmoid(jnp.dot(h_sig, w2_ref[...],
                               preferred_element_type=jnp.float32, precision=prec)
                       + b2_ref[...])
    y = jax.nn.sigmoid(jnp.dot(y, w3_ref[...],
                               preferred_element_type=jnp.float32, precision=prec)
                       + b3_ref[...])
    y = (jnp.dot(y, w4_ref[...], preferred_element_type=jnp.float32, precision=prec)
         + b4_ref[...])

    # Pack both tiny outputs into one lane-dense slab:
    # lanes [0, H) = h_sig, [H, H+O) = y, rest zero-padded.
    pad = out_ref.shape[1] - (H + O)
    slab = jnp.concatenate([h_sig, y, jnp.zeros((B, pad), jnp.float32)], axis=-1)
    out_ref[...] = slab.astype(out_ref.dtype)


def lstm_forward(x, params, t_steps):
    """x: (B, t_steps * input_num) float32.  Returns (h_sig (B,H), y (B, output_num))."""
    w_ih, w_hh, b_ih, b_hh, w2, b2, w3, b3, w4, b4 = params
    B = x.shape[0]
    H = w_hh.shape[1]
    O = w4.shape[0]
    D = x.shape[1] // t_steps

    # Sublane tiling safety: pad batch up to a multiple of 8 if needed.
    Bp = ((B + 7) // 8) * 8
    xp = x if Bp == B else jnp.pad(x, ((0, Bp - B), (0, 0)))

    # Batch-major 2-D view: row b*T + t <-> (batch b, time t).  Pure reshape of
    # a contiguous array (bitcast) -- no standalone transpose/copy launch.
    x_2d = xp.reshape(Bp * t_steps, D)

    # Pre-scale the i/f/o gate columns by 0.5 (exact, power-of-two) so the
    # kernel computes all four gate activations with a single tanh pass.
    gate_scale = jnp.concatenate([
        jnp.full((H,), 0.5, jnp.float32),      # i  (sigmoid via tanh)
        jnp.full((H,), 0.5, jnp.float32),      # f  (sigmoid via tanh)
        jnp.ones((H,), jnp.float32),           # g  (tanh, unscaled)
        jnp.full((H,), 0.5, jnp.float32),      # o  (sigmoid via tanh)
    ])
    wih_t = w_ih.T * gate_scale[None, :]                      # (D, 4H)
    whh_t = w_hh.T * gate_scale[None, :]                      # (H, 4H)
    b = ((b_ih + b_hh) * gate_scale).reshape(1, 4 * H)        # (1, 4H)

    w2_t, b2r = w2.T, b2.reshape(1, -1)                       # (H, F2), (1, F2)
    w3_t, b3r = w3.T, b3.reshape(1, -1)                       # (F2, F3), (1, F3)
    w4_t, b4r = w4.T, b4.reshape(1, -1)                       # (F3, O), (1, O)

    pad_lanes = max(128, ((H + O + 127) // 128) * 128)        # lane-dense output slab

    slab = pl.pallas_call(
        functools.partial(lstm_mlp_kernel, t_steps=t_steps),
        out_shape=jax.ShapeDtypeStruct((Bp, pad_lanes), x.dtype),
        in_specs=[pl.BlockSpec(memory_space=pltpu.MemorySpace.VMEM)] * 10,
        out_specs=pl.BlockSpec(memory_space=pltpu.MemorySpace.VMEM),
    )(x_2d, wih_t, whh_t, b, w2_t, b2r, w3_t, b3r, w4_t, b4r)

    return slab[:B, :H], slab[:B, H:H + O]


def reference(x, params, t_steps):
    """Pure-JAX reference mirroring the PyTorch forward (for correctness check)."""
    w_ih, w_hh, b_ih, b_hh, w2, b2, w3, b3, w4, b4 = params
    B = x.shape[0]
    xs = x.reshape(B, t_steps, -1)
    H = w_hh.shape[1]
    h = jnp.zeros((B, H), jnp.float32)
    c = jnp.zeros((B, H), jnp.float32)
    for s in range(t_steps):
        g = xs[:, s, :] @ w_ih.T + h @ w_hh.T + b_ih + b_hh
        i = jax.nn.sigmoid(g[:, :H])
        f = jax.nn.sigmoid(g[:, H:2 * H])
        gg = jnp.tanh(g[:, 2 * H:3 * H])
        o = jax.nn.sigmoid(g[:, 3 * H:])
        c = f * c + i * gg
        h = o * jnp.tanh(c)
    hs = jax.nn.sigmoid(h)
    y = jax.nn.sigmoid(hs @ w2.T + b2)
    y = jax.nn.sigmoid(y @ w3.T + b3)
    y = y @ w4.T + b4
    return hs, y


def make_params(key, input_num, hidden, output_num):
    """Deterministic synthetic init (PyTorch-style uniform ranges)."""
    ks = jax.random.split(key, 10)
    kH = 1.0 / jnp.sqrt(hidden)
    u = lambda k, shape, bound: jax.random.uniform(k, shape, jnp.float32, -bound, bound)
    w_ih = u(ks[0], (4 * hidden, input_num), kH)
    w_hh = u(ks[1], (4 * hidden, hidden), kH)
    b_ih = u(ks[2], (4 * hidden,), kH)
    b_hh = u(ks[3], (4 * hidden,), kH)
    f2, f3 = output_num * 16, output_num * 4
    w2 = u(ks[4], (f2, hidden), 1.0 / jnp.sqrt(hidden))
    b2 = u(ks[5], (f2,), 1.0 / jnp.sqrt(hidden))
    w3 = u(ks[6], (f3, f2), 1.0 / jnp.sqrt(f2))
    b3 = u(ks[7], (f3,), 1.0 / jnp.sqrt(f2))
    w4 = u(ks[8], (output_num, f3), 1.0 / jnp.sqrt(f3))
    b4 = u(ks[9], (output_num,), 1.0 / jnp.sqrt(f3))
    return (w_ih, w_hh, b_ih, b_hh, w2, b2, w3, b3, w4, b4)


if __name__ == "__main__":
    # Model config: input_num=32, transmission_num (hidden)=32, output_num=8, t=8
    B, T, D, H, OUT = 8, 8, 32, 32, 8

    key = jax.random.PRNGKey(0)
    kx, kp = jax.random.split(key)
    x = jax.random.normal(kx, (B, T * D), jnp.float32)   # module reshapes to (B, T, D)
    params = make_params(kp, D, H, OUT)

    h_sig, y = jax.jit(lstm_forward, static_argnums=2)(x, params, T)
    jax.block_until_ready((h_sig, y))

    h_ref, y_ref = reference(x, params, T)
    assert h_sig.shape == (B, H) and y.shape == (B, OUT)
    # Tolerance slightly loosened vs 1e-5: the sigmoid-via-tanh rewrite uses a
    # different (mathematically identical) transcendental path than jax.nn.sigmoid.
    assert jnp.allclose(h_sig, h_ref, atol=1e-4, rtol=1e-4)
    assert jnp.allclose(y, y_ref, atol=1e-4, rtol=1e-4)

    print("KERNEL_OK")
</pallas_src>

<mosaic_0001>
module attributes {stable_mosaic.version = 11 : i64} {
  func.func @lstm_mlp_kernel(%arg0: memref<64x32xf32, #tpu.memory_space<vmem>>, %arg1: memref<32x128xf32, #tpu.memory_space<vmem>>, %arg2: memref<32x128xf32, #tpu.memory_space<vmem>>, %arg3: memref<1x128xf32, #tpu.memory_space<vmem>>, %arg4: memref<32x128xf32, #tpu.memory_space<vmem>>, %arg5: memref<1x128xf32, #tpu.memory_space<vmem>>, %arg6: memref<128x32xf32, #tpu.memory_space<vmem>>, %arg7: memref<1x32xf32, #tpu.memory_space<vmem>>, %arg8: memref<32x8xf32, #tpu.memory_space<vmem>>, %arg9: memref<1x8xf32, #tpu.memory_space<vmem>>, %arg10: memref<8x128xf32, #tpu.memory_space<vmem>>) attributes {dimension_semantics = [], scalar_prefetch = 0 : i64, scratch_operands = 0 : i64, tpu.core_type = #tpu.core_type<tc>} {
    %c0 = arith.constant 0 : index
    %c0_0 = arith.constant 0 : index
    %0 = vector.load %arg0[%c0, %c0_0] : memref<64x32xf32, #tpu.memory_space<vmem>>, vector<64x32xf32>
    %c0_1 = arith.constant 0 : index
    %c0_2 = arith.constant 0 : index
    %1 = vector.load %arg1[%c0_1, %c0_2] : memref<32x128xf32, #tpu.memory_space<vmem>>, vector<32x128xf32>
    %cst = arith.constant dense<0.000000e+00> : vector<64x128xf32>
    %2 = tpu.matmul %0, %1, %cst {dimension_numbers = #tpu.dot_dimension_numbers<[1], [0], [0], [1], [0, 0, 1, 1], [], []>} : vector<64x32xf32>, vector<32x128xf32>, vector<64x128xf32> -> vector<64x128xf32>
    %c0_3 = arith.constant 0 : index
    %c0_4 = arith.constant 0 : index
    %3 = vector.load %arg3[%c0_3, %c0_4] : memref<1x128xf32, #tpu.memory_space<vmem>>, vector<1x128xf32>
    %4 = vector.broadcast %3 : vector<1x128xf32> to vector<64x128xf32>
    %5 = arith.addf %2, %4 : vector<64x128xf32>
    %6 = vector.shape_cast %5 : vector<64x128xf32> to vector<8x8x128xf32>
    %c0_5 = arith.constant 0 : index
    %c0_6 = arith.constant 0 : index
    %7 = vector.load %arg2[%c0_5, %c0_6] : memref<32x128xf32, #tpu.memory_space<vmem>>, vector<32x128xf32>
    %cst_7 = arith.constant 0.000000e+00 : f32
    %8 = vector.broadcast %cst_7 : f32 to vector<8x32xf32>
    %cst_8 = arith.constant 0.000000e+00 : f32
    %9 = vector.broadcast %cst_8 : f32 to vector<8x32xf32>
    %10 = vector.extract_strided_slice %6 {offsets = [0, 0, 0], sizes = [8, 1, 128], strides = [1, 1, 1]} : vector<8x8x128xf32> to vector<8x1x128xf32>
    %11 = vector.shape_cast %10 : vector<8x1x128xf32> to vector<8x128xf32>
    %cst_9 = arith.constant dense<0.000000e+00> : vector<8x128xf32>
    %12 = tpu.matmul %8, %7, %cst_9 {dimension_numbers = #tpu.dot_dimension_numbers<[1], [0], [0], [1], [0, 0, 1, 1], [], []>} : vector<8x32xf32>, vector<32x128xf32>, vector<8x128xf32> -> vector<8x128xf32>
    %13 = arith.addf %11, %12 : vector<8x128xf32>
    %14 = math.tanh %13 : vector<8x128xf32>
    %cst_10 = arith.constant 5.000000e-01 : f32
    %15 = vector.broadcast %cst_10 : f32 to vector<8x128xf32>
    %16 = arith.mulf %15, %14 : vector<8x128xf32>
    %cst_11 = arith.constant 5.000000e-01 : f32
    %17 = vector.broadcast %cst_11 : f32 to vector<8x128xf32>
    %18 = arith.addf %16, %17 : vector<8x128xf32>
    %19 = vector.extract_strided_slice %18 {offsets = [0, 0], sizes = [8, 32], strides = [1, 1]} : vector<8x128xf32> to vector<8x32xf32>
    %20 = vector.extract_strided_slice %18 {offsets = [0, 32], sizes = [8, 32], strides = [1, 1]} : vector<8x128xf32> to vector<8x32xf32>
    %21 = vector.extract_strided_slice %14 {offsets = [0, 64], sizes = [8, 32], strides = [1, 1]} : vector<8x128xf32> to vector<8x32xf32>
    %22 = vector.extract_strided_slice %18 {offsets = [0, 96], sizes = [8, 32], strides = [1, 1]} : vector<8x128xf32> to vector<8x32xf32>
    %23 = arith.mulf %20, %9 : vector<8x32xf32>
    %24 = arith.mulf %19, %21 : vector<8x32xf32>
    %25 = arith.addf %23, %24 : vector<8x32xf32>
    %26 = math.tanh %25 : vector<8x32xf32>
    %27 = arith.mulf %22, %26 : vector<8x32xf32>
    %28 = vector.extract_strided_slice %6 {offsets = [0, 1, 0], sizes = [8, 1, 128], strides = [1, 1, 1]} : vector<8x8x128xf32> to vector<8x1x128xf32>
    %29 = vector.shape_cast %28 : vector<8x1x128xf32> to vector<8x128xf32>
    %cst_12 = arith.constant dense<0.000000e+00> : vector<8x128xf32>
    %30 = tpu.matmul %27, %7, %cst_12 {dimension_numbers = #tpu.dot_dimension_numbers<[1], [0], [0], [1], [0, 0, 1, 1], [], []>} : vector<8x32xf32>, vector<32x128xf32>, vector<8x128xf32> -> vector<8x128xf32>
    %31 = arith.addf %29, %30 : vector<8x128xf32>
    %32 = math.tanh %31 : vector<8x128xf32>
    %cst_13 = arith.constant 5.000000e-01 : f32
    %33 = vector.broadcast %cst_13 : f32 to vector<8x128xf32>
    %34 = arith.mulf %33, %32 : vector<8x128xf32>
    %cst_14 = arith.constant 5.000000e-01 : f32
    %35 = vector.broadcast %cst_14 : f32 to vector<8x128xf32>
    %36 = arith.addf %34, %35 : vector<8x128xf32>
    %37 = vector.extract_strided_slice %36 {offsets = [0, 0], sizes = [8, 32], strides = [1, 1]} : vector<8x128xf32> to vector<8x32xf32>
    %38 = vector.extract_strided_slice %36 {offsets = [0, 32], sizes = [8, 32], strides = [1, 1]} : vector<8x128xf32> to vector<8x32xf32>
    %39 = vector.extract_strided_slice %32 {offsets = [0, 64], sizes = [8, 32], strides = [1, 1]} : vector<8x128xf32> to vector<8x32xf32>
    %40 = vector.extract_strided_slice %36 {offsets = [0, 96], sizes = [8, 32], strides = [1, 1]} : vector<8x128xf32> to vector<8x32xf32>
    %41 = arith.mulf %38, %25 : vector<8x32xf32>
    %42 = arith.mulf %37, %39 : vector<8x32xf32>
    %43 = arith.addf %41, %42 : vector<8x32xf32>
    %44 = math.tanh %43 : vector<8x32xf32>
    %45 = arith.mulf %40, %44 : vector<8x32xf32>
    %46 = vector.extract_strided_slice %6 {offsets = [0, 2, 0], sizes = [8, 1, 128], strides = [1, 1, 1]} : vector<8x8x128xf32> to vector<8x1x128xf32>
    %47 = vector.shape_cast %46 : vector<8x1x128xf32> to vector<8x128xf32>
    %cst_15 = arith.constant dense<0.000000e+00> : vector<8x128xf32>
    %48 = tpu.matmul %45, %7, %cst_15 {dimension_numbers = #tpu.dot_dimension_numbers<[1], [0], [0], [1], [0, 0, 1, 1], [], []>} : vector<8x32xf32>, vector<32x128xf32>, vector<8x128xf32> -> vector<8x128xf32>
    %49 = arith.addf %47, %48 : vector<8x128xf32>
    %50 = math.tanh %49 : vector<8x128xf32>
    %cst_16 = arith.constant 5.000000e-01 : f32
    %51 = vector.broadcast %cst_16 : f32 to vector<8x128xf32>
    %52 = arith.mulf %51, %50 : vector<8x128xf32>
    %cst_17 = arith.constant 5.000000e-01 : f32
    %53 = vector.broadcast %cst_17 : f32 to vector<8x128xf32>
    %54 = arith.addf %52, %53 : vector<8x128xf32>
    %55 = vector.extract_strided_slice %54 {offsets = [0, 0], sizes = [8, 32], strides = [1, 1]} : vector<8x128xf32> to vector<8x32xf32>
    %56 = vector.extract_strided_slice %54 {offsets = [0, 32], sizes = [8, 32], strides = [1, 1]} : vector<8x128xf32> to vector<8x32xf32>
    %57 = vector.extract_strided_slice %50 {offsets = [0, 64], sizes = [8, 32], strides = [1, 1]} : vector<8x128xf32> to vector<8x32xf32>
    %58 = vector.extract_strided_slice %54 {offsets = [0, 96], sizes = [8, 32], strides = [1, 1]} : vector<8x128xf32> to vector<8x32xf32>
    %59 = arith.mulf %56, %43 : vector<8x32xf32>
    %60 = arith.mulf %55, %57 : vector<8x32xf32>
    %61 = arith.addf %59, %60 : vector<8x32xf32>
    %62 = math.tanh %61 : vector<8x32xf32>
    %63 = arith.mulf %58, %62 : vector<8x32xf32>
    %64 = vector.extract_strided_slice %6 {offsets = [0, 3, 0], sizes = [8, 1, 128], strides = [1, 1, 1]} : vector<8x8x128xf32> to vector<8x1x128xf32>
    %65 = vector.shape_cast %64 : vector<8x1x128xf32> to vector<8x128xf32>
    %cst_18 = arith.constant dense<0.000000e+00> : vector<8x128xf32>
    %66 = tpu.matmul %63, %7, %cst_18 {dimension_numbers = #tpu.dot_dimension_numbers<[1], [0], [0], [1], [0, 0, 1, 1], [], []>} : vector<8x32xf32>, vector<32x128xf32>, vector<8x128xf32> -> vector<8x128xf32>
    %67 = arith.addf %65, %66 : vector<8x128xf32>
    %68 = math.tanh %67 : vector<8x128xf32>
    %cst_19 = arith.constant 5.000000e-01 : f32
    %69 = vector.broadcast %cst_19 : f32 to vector<8x128xf32>
    %70 = arith.mulf %69, %68 : vector<8x128xf32>
    %cst_20 = arith.constant 5.000000e-01 : f32
    %71 = vector.broadcast %cst_20 : f32 to vector<8x128xf32>
    %72 = arith.addf %70, %71 : vector<8x128xf32>
    %73 = vector.extract_strided_slice %72 {offsets = [0, 0], sizes = [8, 32], strides = [1, 1]} : vector<8x128xf32> to vector<8x32xf32>
    %74 = vector.extract_strided_slice %72 {offsets = [0, 32], sizes = [8, 32], strides = [1, 1]} : vector<8x128xf32> to vector<8x32xf32>
    %75 = vector.extract_strided_slice %68 {offsets = [0, 64], sizes = [8, 32], strides = [1, 1]} : vector<8x128xf32> to vector<8x32xf32>
    %76 = vector.extract_strided_slice %72 {offsets = [0, 96], sizes = [8, 32], strides = [1, 1]} : vector<8x128xf32> to vector<8x32xf32>
    %77 = arith.mulf %74, %61 : vector<8x32xf32>
    %78 = arith.mulf %73, %75 : vector<8x32xf32>
    %79 = arith.addf %77, %78 : vector<8x32xf32>
    %80 = math.tanh %79 : vector<8x32xf32>
    %81 = arith.mulf %76, %80 : vector<8x32xf32>
    %82 = vector.extract_strided_slice %6 {offsets = [0, 4, 0], sizes = [8, 1, 128], strides = [1, 1, 1]} : vector<8x8x128xf32> to vector<8x1x128xf32>
    %83 = vector.shape_cast %82 : vector<8x1x128xf32> to vector<8x128xf32>
    %cst_21 = arith.constant dense<0.000000e+00> : vector<8x128xf32>
    %84 = tpu.matmul %81, %7, %cst_21 {dimension_numbers = #tpu.dot_dimension_numbers<[1], [0], [0], [1], [0, 0, 1, 1], [], []>} : vector<8x32xf32>, vector<32x128xf32>, vector<8x128xf32> -> vector<8x128xf32>
    %85 = arith.addf %83, %84 : vector<8x128xf32>
    %86 = math.tanh %85 : vector<8x128xf32>
    %cst_22 = arith.constant 5.000000e-01 : f32
    %87 = vector.broadcast %cst_22 : f32 to vector<8x128xf32>
    %88 = arith.mulf %87, %86 : vector<8x128xf32>
    %cst_23 = arith.constant 5.000000e-01 : f32
    %89 = vector.broadcast %cst_23 : f32 to vector<8x128xf32>
    %90 = arith.addf %88, %89 : vector<8x128xf32>
    %91 = vector.extract_strided_slice %90 {offsets = [0, 0], sizes = [8, 32], strides = [1, 1]} : vector<8x128xf32> to vector<8x32xf32>
    %92 = vector.extract_strided_slice %90 {offsets = [0, 32], sizes = [8, 32], strides = [1, 1]} : vector<8x128xf32> to vector<8x32xf32>
    %93 = vector.extract_strided_slice %86 {offsets = [0, 64], sizes = [8, 32], strides = [1, 1]} : vector<8x128xf32> to vector<8x32xf32>
    %94 = vector.extract_strided_slice %90 {offsets = [0, 96], sizes = [8, 32], strides = [1, 1]} : vector<8x128xf32> to vector<8x32xf32>
    %95 = arith.mulf %92, %79 : vector<8x32xf32>
    %96 = arith.mulf %91, %93 : vector<8x32xf32>
    %97 = arith.addf %95, %96 : vector<8x32xf32>
    %98 = math.tanh %97 : vector<8x32xf32>
    %99 = arith.mulf %94, %98 : vector<8x32xf32>
    %100 = vector.extract_strided_slice %6 {offsets = [0, 5, 0], sizes = [8, 1, 128], strides = [1, 1, 1]} : vector<8x8x128xf32> to vector<8x1x128xf32>
    %101 = vector.shape_cast %100 : vector<8x1x128xf32> to vector<8x128xf32>
    %cst_24 = arith.constant dense<0.000000e+00> : vector<8x128xf32>
    %102 = tpu.matmul %99, %7, %cst_24 {dimension_numbers = #tpu.dot_dimension_numbers<[1], [0], [0], [1], [0, 0, 1, 1], [], []>} : vector<8x32xf32>, vector<32x128xf32>, vector<8x128xf32> -> vector<8x128xf32>
    %103 = arith.addf %101, %102 : vector<8x128xf32>
    %104 = math.tanh %103 : vector<8x128xf32>
    %cst_25 = arith.constant 5.000000e-01 : f32
    %105 = vector.broadcast %cst_25 : f32 to vector<8x128xf32>
    %106 = arith.mulf %105, %104 : vector<8x128xf32>
    %cst_26 = arith.constant 5.000000e-01 : f32
    %107 = vector.broadcast %cst_26 : f32 to vector<8x128xf32>
    %108 = arith.addf %106, %107 : vector<8x128xf32>
    %109 = vector.extract_strided_slice %108 {offsets = [0, 0], sizes = [8, 32], strides = [1, 1]} : vector<8x128xf32> to vector<8x32xf32>
    %110 = vector.extract_strided_slice %108 {offsets = [0, 32], sizes = [8, 32], strides = [1, 1]} : vector<8x128xf32> to vector<8x32xf32>
    %111 = vector.extract_strided_slice %104 {offsets = [0, 64], sizes = [8, 32], strides = [1, 1]} : vector<8x128xf32> to vector<8x32xf32>
    %112 = vector.extract_strided_slice %108 {offsets = [0, 96], sizes = [8, 32], strides = [1, 1]} : vector<8x128xf32> to vector<8x32xf32>
    %113 = arith.mulf %110, %97 : vector<8x32xf32>
    %114 = arith.mulf %109, %111 : vector<8x32xf32>
    %115 = arith.addf %113, %114 : vector<8x32xf32>
    %116 = math.tanh %115 : vector<8x32xf32>
    %117 = arith.mulf %112, %116 : vector<8x32xf32>
    %118 = vector.extract_strided_slice %6 {offsets = [0, 6, 0], sizes = [8, 1, 128], strides = [1, 1, 1]} : vector<8x8x128xf32> to vector<8x1x128xf32>
    %119 = vector.shape_cast %118 : vector<8x1x128xf32> to vector<8x128xf32>
    %cst_27 = arith.constant dense<0.000000e+00> : vector<8x128xf32>
    %120 = tpu.matmul %117, %7, %cst_27 {dimension_numbers = #tpu.dot_dimension_numbers<[1], [0], [0], [1], [0, 0, 1, 1], [], []>} : vector<8x32xf32>, vector<32x128xf32>, vector<8x128xf32> -> vector<8x128xf32>
    %121 = arith.addf %119, %120 : vector<8x128xf32>
    %122 = math.tanh %121 : vector<8x128xf32>
    %cst_28 = arith.constant 5.000000e-01 : f32
    %123 = vector.broadcast %cst_28 : f32 to vector<8x128xf32>
    %124 = arith.mulf %123, %122 : vector<8x128xf32>
    %cst_29 = arith.constant 5.000000e-01 : f32
    %125 = vector.broadcast %cst_29 : f32 to vector<8x128xf32>
    %126 = arith.addf %124, %125 : vector<8x128xf32>
    %127 = vector.extract_strided_slice %126 {offsets = [0, 0], sizes = [8, 32], strides = [1, 1]} : vector<8x128xf32> to vector<8x32xf32>
    %128 = vector.extract_strided_slice %126 {offsets = [0, 32], sizes = [8, 32], strides = [1, 1]} : vector<8x128xf32> to vector<8x32xf32>
    %129 = vector.extract_strided_slice %122 {offsets = [0, 64], sizes = [8, 32], strides = [1, 1]} : vector<8x128xf32> to vector<8x32xf32>
    %130 = vector.extract_strided_slice %126 {offsets = [0, 96], sizes = [8, 32], strides = [1, 1]} : vector<8x128xf32> to vector<8x32xf32>
    %131 = arith.mulf %128, %115 : vector<8x32xf32>
    %132 = arith.mulf %127, %129 : vector<8x32xf32>
    %133 = arith.addf %131, %132 : vector<8x32xf32>
    %134 = math.tanh %133 : vector<8x32xf32>
    %135 = arith.mulf %130, %134 : vector<8x32xf32>
    %136 = vector.extract_strided_slice %6 {offsets = [0, 7, 0], sizes = [8, 1, 128], strides = [1, 1, 1]} : vector<8x8x128xf32> to vector<8x1x128xf32>
    %137 = vector.shape_cast %136 : vector<8x1x128xf32> to vector<8x128xf32>
    %cst_30 = arith.constant dense<0.000000e+00> : vector<8x128xf32>
    %138 = tpu.matmul %135, %7, %cst_30 {dimension_numbers = #tpu.dot_dimension_numbers<[1], [0], [0], [1], [0, 0, 1, 1], [], []>} : vector<8x32xf32>, vector<32x128xf32>, vector<8x128xf32> -> vector<8x128xf32>
    %139 = arith.addf %137, %138 : vector<8x128xf32>
    %140 = math.tanh %139 : vector<8x128xf32>
    %cst_31 = arith.constant 5.000000e-01 : f32
    %141 = vector.broadcast %cst_31 : f32 to vector<8x128xf32>
    %142 = arith.mulf %141, %140 : vector<8x128xf32>
    %cst_32 = arith.constant 5.000000e-01 : f32
    %143 = vector.broadcast %cst_32 : f32 to vector<8x128xf32>
    %144 = arith.addf %142, %143 : vector<8x128xf32>
    %145 = vector.extract_strided_slice %144 {offsets = [0, 0], sizes = [8, 32], strides = [1, 1]} : vector<8x128xf32> to vector<8x32xf32>
    %146 = vector.extract_strided_slice %144 {offsets = [0, 32], sizes = [8, 32], strides = [1, 1]} : vector<8x128xf32> to vector<8x32xf32>
    %147 = vector.extract_strided_slice %140 {offsets = [0, 64], sizes = [8, 32], strides = [1, 1]} : vector<8x128xf32> to vector<8x32xf32>
    %148 = vector.extract_strided_slice %144 {offsets = [0, 96], sizes = [8, 32], strides = [1, 1]} : vector<8x128xf32> to vector<8x32xf32>
    %149 = arith.mulf %146, %133 : vector<8x32xf32>
    %150 = arith.mulf %145, %147 : vector<8x32xf32>
    %151 = arith.addf %149, %150 : vector<8x32xf32>
    %152 = math.tanh %151 : vector<8x32xf32>
    %153 = arith.mulf %148, %152 : vector<8x32xf32>
    %154 = arith.negf %153 : vector<8x32xf32>
    %155 = math.exp %154 : vector<8x32xf32>
    %cst_33 = arith.constant 1.000000e+00 : f32
    %156 = vector.broadcast %cst_33 : f32 to vector<8x32xf32>
    %157 = arith.addf %156, %155 : vector<8x32xf32>
    %158 = arith.divf %156, %157 : vector<8x32xf32>
    %c0_34 = arith.constant 0 : index
    %c0_35 = arith.constant 0 : index
    %159 = vector.load %arg4[%c0_34, %c0_35] : memref<32x128xf32, #tpu.memory_space<vmem>>, vector<32x128xf32>
    %cst_36 = arith.constant dense<0.000000e+00> : vector<8x128xf32>
    %160 = tpu.matmul %158, %159, %cst_36 {dimension_numbers = #tpu.dot_dimension_numbers<[1], [0], [0], [1], [0, 0, 1, 1], [], []>} : vector<8x32xf32>, vector<32x128xf32>, vector<8x128xf32> -> vector<8x128xf32>
    %c0_37 = arith.constant 0 : index
    %c0_38 = arith.constant 0 : index
    %161 = vector.load %arg5[%c0_37, %c0_38] : memref<1x128xf32, #tpu.memory_space<vmem>>, vector<1x128xf32>
    %162 = vector.broadcast %161 : vector<1x128xf32> to vector<8x128xf32>
    %163 = arith.addf %160, %162 : vector<8x128xf32>
    %164 = arith.negf %163 : vector<8x128xf32>
    %165 = math.exp %164 : vector<8x128xf32>
    %cst_39 = arith.constant 1.000000e+00 : f32
    %166 = vector.broadcast %cst_39 : f32 to vector<8x128xf32>
    %167 = arith.addf %166, %165 : vector<8x128xf32>
    %168 = arith.divf %166, %167 : vector<8x128xf32>
    %c0_40 = arith.constant 0 : index
    %c0_41 = arith.constant 0 : index
    %169 = vector.load %arg6[%c0_40, %c0_41] : memref<128x32xf32, #tpu.memory_space<vmem>>, vector<128x32xf32>
    %cst_42 = arith.constant dense<0.000000e+00> : vector<8x32xf32>
    %170 = tpu.matmul %168, %169, %cst_42 {dimension_numbers = #tpu.dot_dimension_numbers<[1], [0], [0], [1], [0, 0, 1, 1], [], []>} : vector<8x128xf32>, vector<128x32xf32>, vector<8x32xf32> -> vector<8x32xf32>
    %c0_43 = arith.constant 0 : index
    %c0_44 = arith.constant 0 : index
    %171 = vector.load %arg7[%c0_43, %c0_44] : memref<1x32xf32, #tpu.memory_space<vmem>>, vector<1x32xf32>
    %172 = vector.broadcast %171 : vector<1x32xf32> to vector<8x32xf32>
    %173 = arith.addf %170, %172 : vector<8x32xf32>
    %174 = arith.negf %173 : vector<8x32xf32>
    %175 = math.exp %174 : vector<8x32xf32>
    %cst_45 = arith.constant 1.000000e+00 : f32
    %176 = vector.broadcast %cst_45 : f32 to vector<8x32xf32>
    %177 = arith.addf %176, %175 : vector<8x32xf32>
    %178 = arith.divf %176, %177 : vector<8x32xf32>
    %c0_46 = arith.constant 0 : index
    %c0_47 = arith.constant 0 : index
    %179 = vector.load %arg8[%c0_46, %c0_47] : memref<32x8xf32, #tpu.memory_space<vmem>>, vector<32x8xf32>
    %cst_48 = arith.constant dense<0.000000e+00> : vector<8x8xf32>
    %180 = tpu.matmul %178, %179, %cst_48 {dimension_numbers = #tpu.dot_dimension_numbers<[1], [0], [0], [1], [0, 0, 1, 1], [], []>} : vector<8x32xf32>, vector<32x8xf32>, vector<8x8xf32> -> vector<8x8xf32>
    %c0_49 = arith.constant 0 : index
    %c0_50 = arith.constant 0 : index
    %181 = vector.load %arg9[%c0_49, %c0_50] : memref<1x8xf32, #tpu.memory_space<vmem>>, vector<1x8xf32>
    %182 = vector.broadcast %181 : vector<1x8xf32> to vector<8x8xf32>
    %183 = arith.addf %180, %182 : vector<8x8xf32>
    %cst_51 = arith.constant 0.000000e+00 : f32
    %184 = vector.broadcast %cst_51 : f32 to vector<8x88xf32>
    %185 = tpu.concatenate %158, %183, %184 in 1 : vector<8x32xf32>, vector<8x8xf32>, vector<8x88xf32> -> vector<8x128xf32>
    %c0_52 = arith.constant 0 : index
    %c0_53 = arith.constant 0 : index
    %186 = vector.load %arg10[%c0_52, %c0_53] : memref<8x128xf32, #tpu.memory_space<vmem>>, vector<8x128xf32>
    tpu.vector_store %arg10[%c0_52, %c0_53], %185 {strides = array<i32>} : memref<8x128xf32, #tpu.memory_space<vmem>>, vector<8x128xf32>,
    return
  }
}

</mosaic_0001>

<bundles_post_ra>
// kernel: lstm_forward.1
= control target key start
LH: loop header
LB: loop body
LE: loop exit
PB: predicated region body
PF: predicated region fallthrough
CT: control target
= control target key end

     0   :  { %vm54_vm0 = vcmask 261120   ;;  %v3538_v2 = vmov 0.0   ;;  %vm3539_vm1 = vmmov 0   ;;  %s3541_s25 = smov 32   ;;  %vm454_vm2 = vcmask 1041409   ;;  %s4782_s1 = inlined_call_operand.vmem [shape: f32[32,128], index: 1, kind: input, shape index: {}]   ;;  %s4783_s0 = inlined_call_operand.vmem [shape: f32[64,32], index: 0, kind: input, shape index: {}]   ;;  %s4784_s2 = inlined_call_operand.vmem [shape: f32[32,128], index: 2, kind: input, shape index: {}]   ;;  %s4785_s3 = inlined_call_operand.vmem [shape: f32[1,128], index: 3, kind: input, shape index: {}]   ;;  %s4786_s4 = inlined_call_operand.vmem [shape: f32[32,128], index: 4, kind: input, shape index: {}]   ;;  %s4787_s6 = inlined_call_operand.vmem [shape: f32[128,32], index: 6, kind: input, shape index: {}]   ;;  %s4788_s5 = inlined_call_operand.vmem [shape: f32[1,128], index: 5, kind: input, shape index: {}]   ;;  %s4789_s8 = inlined_call_operand.vmem [shape: f32[32,8], index: 8, kind: input, shape index: {}]   ;;  %s4790_s7 = inlined_call_operand.vmem [shape: f32[1,32], index: 7, kind: input, shape index: {}]   ;;  %s4791_s9 = inlined_call_operand.vmem [shape: f32[1,8], index: 9, kind: input, shape index: {}]   ;;  %s4792_s10 = inlined_call_operand.vmem [shape: f32[8,128], index: 10, kind: output, shape index: {}]  }
   0x1   :  { %v46_v0 = vld [vmem:[%s4782_s1 + $0x18] sm:$0xff]  ;;  %v45_v1 = vld [vmem:[%s4782_s1 + $0x10] sm:$0xff]  ;;  %3100 = vmatprep.subr.mxu1 %v3538_v2  ;;  %3108 = vmatprep.mubr.msk.f32.mxu1 %vm3539_vm1, %v3538_v2  ;;  %v35_v3 = vld [vmem:[%s4783_s0] sm:$0xff]  ;;  %vm457_vm3 = vcmask 1042434   ;;  %vm460_vm4 = vcmask 1043459   ;;  %vm463_vm5 = vcmask 1044484  }
   0x2   :  { %3069 = vmatprep.subr.mxu0 %v46_v0  ;;  %v44_v4 = vld [vmem:[%s4782_s1 + $0x8] sm:$0xff]  ;;  %3077 = vmatprep.mubr.msk.f32.mxu0 %vm54_vm0, %v35_v3  ;;  %v3616_v5 = vld [vmem:[%s4784_s2 + $0x18] sm:$0xff]  ;;  %v43_v6 = vld [vmem:[%s4782_s1] sm:$0xff]  ;;  %vm466_vm6 = vcmask 1045509   ;;  %vm469_vm7 = vcmask 1046534   ;;  %vm472_vm8 = vcmask 1047559  }
   0x3   :  { %3070 = vmatpush3.msra.mxu0 %v46_v0  ;;  %3101 = vmatpush3.msra.mxu1 %v3616_v5  ;;  %v3625_v7 = vld [vmem:[%s4784_s2 + $0x10] sm:$0xff]  ;;  %v36_v8 = vld [vmem:[%s4783_s0 + $0x8] sm:$0xff]  ;;  %v38_v11 = vld [vmem:[%s4783_s0 + $0x18] sm:$0xff]  ;;  %vm2950_vm9 = vcmask 326656  }
   0x4   :  { %3071 = vmatprep.subr.mxu0 %v45_v1  ;;  %3102 = vmatprep.subr.mxu1 %v3538_v2  ;;  %v3635_v9 = vld [vmem:[%s4784_s2 + $0x8] sm:$0xff]  ;;  %v37_v10 = vld [vmem:[%s4783_s0 + $0x10] sm:$0xff]  ;;  %v3653_v12 = vld [vmem:[%s4784_s2] sm:$0xff] }
   0x5   :  { %3072 = vmatpush3.msra.mxu0 %v45_v1  ;;  %3103 = vmatpush3.msra.mxu1 %v3625_v7  ;;  %v39_v13 = vld [vmem:[%s4783_s0 + $0x20] sm:$0xff]  ;;  %v40_v14 = vld [vmem:[%s4783_s0 + $0x28] sm:$0xff]  ;;  %v41_v15 = vld [vmem:[%s4783_s0 + $0x30] sm:$0xff] }
   0x6   :  { %3073 = vmatprep.subr.mxu0 %v44_v4  ;;  %3104 = vmatprep.subr.mxu1 %v3538_v2  ;;  %v42_v16 = vld [vmem:[%s4783_s0 + $0x38] sm:$0xff]  ;;  %v2959_v25 = vld [vmem:[%s4785_s3] ss:$0 sm:$0xff]  ;;  %s3540_s3 = smov 64  }
   0x7   :  { %3074 = vmatpush3.msra.mxu0 %v44_v4  ;;  %3105 = vmatpush3.msra.mxu1 %v3635_v9 }
   0x8   :  { %3075 = vmatprep.subr.mxu0 %v43_v6  ;;  %3106 = vmatprep.subr.mxu1 %v3538_v2 }
   0x9   :  { %3076 = vmatpush3.msra.mxu0 %v43_v6  ;;  %3107 = vmatpush3.msra.mxu1 %v3653_v12 }
   0xa   :  { %3078 = vmatmul.mubr.msk.f32.vlgmr.msra.gmra.mxu0 %vm54_vm0, %v36_v8  ;;  %3089 = vmatprep.subr.mxu0 %v3538_v2 }
   0xb   :  { %3090 = vmatpush3.msra.mxu0 %v3616_v5  ;;  %3080 = vmatprep.mubr.msk.f32.mxu0 %vm54_vm0, %v37_v10 }
   0xc   :  { %3091 = vmatprep.subr.mxu0 %v3538_v2  ;;  %3122 = vmatprep.subr.mxu1 %v3538_v2 }
   0xd   :  { %3092 = vmatpush3.msra.mxu0 %v3625_v7 }
   0xe   :  { %3081 = vmatmul.mubr.msk.f32.gmra.mxu0 %vm54_vm0, %v38_v11  ;;  %3093 = vmatprep.subr.mxu0 %v3538_v2 }
   0xf   :  { %3083 = vmatprep.mubr.msk.f32.mxu0 %vm54_vm0, %v39_v13  ;;  %3094 = vmatpush3.msra.mxu0 %v3635_v9 }
  0x10   :  { %3095 = vmatprep.subr.mxu0 %v3538_v2 }
  0x11   :  { %3096 = vmatpush3.msra.mxu0 %v3653_v12 }
  0x12   :  { %3084 = vmatmul.mubr.msk.f32.gmra.mxu0 %vm54_vm0, %v40_v14  ;;  %3111 = vmatprep.subr.mxu0 %v3538_v2 }
  0x13   :  { %3086 = vmatprep.mubr.msk.f32.mxu0 %vm54_vm0, %v41_v15 }
  0x16   :  { %3087 = vmatmul.mubr.msk.f32.gmra.mxu0 %vm54_vm0, %v42_v16 }
  0x17   :  { %3097 = vmatprep.mubr.msk.f32.mxu0 %vm3539_vm1, %v3538_v2 }
  0x1a   :  { %3098 = vmatmul.mubr.f32.vlgmr.msra.gmra.mxu0 %v3538_v2 }
  0x1b   :  { %3112 = vmatpush3.msra.mxu0 %v3616_v5  ;;  %3119 = vmatprep.mubr.msk.f32.mxu0 %vm3539_vm1, %v3538_v2 }
  0x1c   :  { %3113 = vmatprep.subr.mxu0 %v3538_v2 }
  0x1d   :  { %3114 = vmatpush3.msra.mxu0 %v3625_v7 }
  0x1e   :  { %3115 = vmatprep.subr.mxu0 %v3538_v2 }
  0x1f   :  { %3116 = vmatpush3.msra.mxu0 %v3635_v9 }
  0x20   :  { %3117 = vmatprep.subr.mxu0 %v3538_v2 }
  0x21   :  { %3118 = vmatpush3.msra.mxu0 %v3653_v12 }
  0x22   :  { %3133 = vmatprep.subr.mxu0 %v3538_v2 }
  0xca   :  { %v3079_v17 = vpop.f32.mrf.mxu0 }
  0xcb   :  { %v3703_v35 = vadd.f32 %v3079_v17, %v2959_v25 }
  0xcc   :  { %v145_v18 = vpop.f32.mrf.mxu0 }
  0xcd   :  { %v3697_v26 = vadd.f32 %v2959_v25, %v145_v18 }
  0xce   :  { %v3082_v19 = vpop.f32.mrf.mxu0 }
  0xcf   :  { %v3699_v29 = vadd.f32 %v3082_v19, %v2959_v25 }
  0xd0   :  { %v155_v20 = vpop.f32.mrf.mxu0 }
  0xd1   :  { %v3709_v41 = vadd.f32 %v2959_v25, %v155_v20 }
  0xd2   :  { %v3085_v21 = vpop.f32.mrf.mxu0 }
  0xd3   :  { %v3705_v36 = vadd.f32 %v3085_v21, %v2959_v25 }
  0xd4   :  { %v165_v22 = vpop.f32.mrf.mxu0 }
  0xd5   :  { %v3715_v46 = vadd.f32 %v2959_v25, %v165_v22 }
  0xd6   :  { %v3088_v23 = vpop.f32.mrf.mxu0 }
  0xd7   :  { %v3711_v42 = vadd.f32 %v3088_v23, %v2959_v25 }
  0xd8   :  { %v175_v24 = vpop.f32.mrf.mxu0 }
  0xd9   :  { %v3718_v50 = vadd.f32 %v2959_v25, %v175_v24 }
  0xda   :  { %v257_v27 = vpop.f32.mrf.mxu0 }
  0xdb   :  { %v264_v28 = vrot.slane %v257_v27, 3  ;;  %v277_v31 = vadd.f32 %v257_v27, %v3697_v26  ;;  %v262_v32 = vrot.slane %v257_v27, 1  ;;  %v266_v33 = vrot.slane %v257_v27, 5 }
  0xdc   :  { %v3099_v30 = vpop.f32.mrf.mxu0  ;;  %v263_v37 = vrot.slane %v257_v27, 2  ;;  %v268_v39 = vrot.slane %v257_v27, 7  ;;  %v265_v43 = vrot.slane %v257_v27, 4  ;;  %v267_v47 = vrot.slane %v257_v27, 6 }
  0xdd   :  { %v280_v34 = vadd.f32 %v264_v28, %v3699_v29  ;;  %3238 = vtanh.f32 %v277_v31  ;;  %v278_v38 = vadd.f32 %v262_v32, %v3703_v35  ;;  %v282_v40 = vadd.f32 %v266_v33, %v3705_v36 }
  0xde   :  { %v279_v44 = vadd.f32 %v263_v37, %v3709_v41  ;;  %v284_v45 = vadd.f32 %v268_v39, %v3711_v42  ;;  %v281_v48 = vadd.f32 %v265_v43, %v3715_v46  ;;  %v283_v51 = vadd.f32 %v267_v47, %v3718_v50 }
  0xdf   :  { %3240 = vtanh.f32 %v280_v34 }
  0xe0   :  { %3242 = vtanh.f32 %v278_v38 }
  0xe1   :  { %3244 = vtanh.f32 %v282_v40 }
  0xe2   :  { %3246 = vtanh.f32 %v279_v44 }
  0xe3   :  { %3248 = vtanh.f32 %v284_v45 }
  0xe4   :  { %3250 = vtanh.f32 %v281_v48 }
  0xe5   :  { %3252 = vtanh.f32 %v283_v51 }
  0xea   :  { %v3239_v49 = vpop.eup %3238 }
  0xeb   :  { %325 = vrot.lane.b32.xlu1 %v3239_v49, %s3540_s3  ;;  %v293_v59 = vmul.f32 0.5, %v3239_v49 }
  0xec   :  { %v3241_v52 = vpop.eup %3240 }
  0xed   :  { %v3243_v53 = vpop.eup %3242  ;;  %v3729_v60 = vadd.f32 0.5, %v293_v59  ;;  %v296_v8 = vmul.f32 0.5, %v3241_v52 }
  0xee   :  { %v3245_v54 = vpop.eup %3244  ;;  %327 = vrot.lane.b32.xlu0 %v3243_v53, %s3540_s3  ;;  %v294_v63 = vmul.f32 0.5, %v3243_v53 }
  0xef   :  { %331 = vrot.lane.b32.xlu1 %v3241_v52, %s3540_s3  ;;  %v3247_v55 = vpop.eup %3246  ;;  %v3740_v15 = vadd.f32 0.5, %v296_v8  ;;  %v298_v16 = vmul.f32 0.5, %v3245_v54  ;;  %v309_v34 = vmul.f32 0.0, %v3729_v60 }
  0xf0   :  { %v3249_v56 = vpop.eup %3248  ;;  %v3733_v0 = vadd.f32 0.5, %v294_v63  ;;  %v295_v1 = vmul.f32 0.5, %v3247_v55 }
  0xf1   :  { %v3251_v57 = vpop.eup %3250  ;;  %v3747_v23 = vadd.f32 0.5, %v298_v16  ;;  %v300_v24 = vmul.f32 0.5, %v3249_v56  ;;  %v312_v48 = vmul.f32 0.0, %v3740_v15 }
  0xf2   :  { %329 = vrot.lane.b32.xlu0 %v3247_v55, %s3540_s3  ;;  %v3253_v58 = vpop.eup %3252  ;;  %v3736_v10 = vadd.f32 0.5, %v295_v1  ;;  %v297_v11 = vmul.f32 0.5, %v3251_v57  ;;  %v310_v39 = vmul.f32 0.0, %v3733_v0 }
  0xf3   :  { %335 = vrot.lane.b32.xlu1 %v3245_v54, %s3540_s3  ;;  %v299_v18 = vmul.f32 0.5, %v3253_v58  ;;  %v3755_v32 = vadd.f32 0.5, %v300_v24 }
  0xf4   :  { %v3743_v17 = vadd.f32 0.5, %v297_v11  ;;  %v311_v44 = vmul.f32 0.0, %v3736_v10 }
  0xf5   :  { %v3751_v25 = vadd.f32 0.5, %v299_v18  ;;  %v316_v63 = vmul.f32 0.0, %v3755_v32 }
  0xf6   :  { %333 = vrot.lane.b32.xlu0 %v3251_v57, %s3540_s3  ;;  %v313_v49 = vmul.f32 0.0, %v3743_v17 }
  0xf7   :  { %339 = vrot.lane.b32.xlu1 %v3249_v56, %s3540_s3  ;;  %v314_v56 = vmul.f32 0.0, %v3747_v23  ;;  %v315_v57 = vmul.f32 0.0, %v3751_v25 }
  0xfa   :  { %337 = vrot.lane.b32.xlu0 %v3253_v58, %s3540_s3 }
 0x15d   :  { %v326_v61 = vpop.permute.xlu1 %325 }
 0x15e   :  { %v349_v62 = vmul.f32 %v326_v61, %v3729_v60 }
 0x160   :  { %365 = vrot.lane.b32.xlu0 %v349_v62, %s3541_s25  ;;  %v328_v3 = vpop.permute.xlu0 %327 }
 0x161   :  { %v350_v4 = vmul.f32 %v328_v3, %v3733_v0  ;;  %v332_v6 = vpop.permute.xlu1 %331 }
 0x162   :  { %v352_v21 = vmul.f32 %v332_v6, %v3740_v15 }
 0x164   :  { %367 = vrot.lane.b32.xlu0 %v350_v4, %s3541_s25  ;;  %v330_v13 = vpop.permute.xlu0 %329 }
 0x165   :  { %v351_v14 = vmul.f32 %v330_v13, %v3736_v10  ;;  %v336_v19 = vpop.permute.xlu1 %335 }
 0x166   :  { %v354_v28 = vmul.f32 %v336_v19, %v3747_v23 }
 0x167   :  { %369 = vrot.lane.b32.xlu1 %v351_v14, %s3541_s25 }
 0x168   :  { %v334_v20 = vpop.permute.xlu0 %333 }
 0x169   :  { %v353_v22 = vmul.f32 %v334_v20, %v3743_v17  ;;  %v340_v31 = vpop.permute.xlu1 %339 }
 0x16a   :  { %v356_v33 = vmul.f32 %v340_v31, %v3755_v32 }
 0x16b   :  { %371 = vrot.lane.b32.xlu1 %v352_v21, %s3541_s25  ;;  %373 = vrot.lane.b32.xlu0 %v353_v22, %s3541_s25 }
 0x16c   :  { %v338_v27 = vpop.permute.xlu0 %337 }
 0x16d   :  { %v355_v30 = vmul.f32 %v338_v27, %v3751_v25 }
 0x16f   :  { %375 = vrot.lane.b32.xlu1 %v354_v28, %s3541_s25  ;;  %377 = vrot.lane.b32.xlu0 %v355_v30, %s3541_s25 }
 0x173   :  { %379 = vrot.lane.b32.xlu1 %v356_v33, %s3541_s25 }
 0x1d2   :  { %v366_v37 = vpop.permute.xlu0 %365 }
 0x1d3   :  { %v3762_v38 = vadd.f32 %v366_v37, %v309_v34 }
 0x1d5   :  { %3254 = vtanh.f32 %v3762_v38 }
 0x1d6   :  { %v368_v40 = vpop.permute.xlu0 %367 }
 0x1d7   :  { %v3766_v43 = vadd.f32 %v368_v40, %v310_v39 }
 0x1d9   :  { %3256 = vtanh.f32 %v3766_v43  ;;  %v370_v45 = vpop.permute.xlu1 %369 }
 0x1da   :  { %v3770_v47 = vadd.f32 %v370_v45, %v311_v44 }
 0x1dc   :  { %3258 = vtanh.f32 %v3770_v47 }
 0x1dd   :  { %v372_v51 = vpop.permute.xlu1 %371  ;;  %v374_v52 = vpop.permute.xlu0 %373 }
 0x1de   :  { %v3775_v54 = vadd.f32 %v372_v51, %v312_v48  ;;  %v3777_v55 = vadd.f32 %v374_v52, %v313_v49 }
 0x1e0   :  { %3260 = vtanh.f32 %v3775_v54 }
 0x1e1   :  { %3262 = vtanh.f32 %v3777_v55  ;;  %v376_v58 = vpop.permute.xlu1 %375  ;;  %v378_v59 = vpop.permute.xlu0 %377 }
 0x1e2   :  { %v3255_v53 = vpop.eup %3254  ;;  %v3784_v61 = vadd.f32 %v376_v58, %v314_v56  ;;  %v3786_v62 = vadd.f32 %v378_v59, %v315_v57 }
 0x1e3   :  { %413 = vrot.lane.b32.xlu0 %v3255_v53, %s3540_s3 }
 0x1e4   :  { %3264 = vtanh.f32 %v3784_v61 }
 0x1e5   :  { %3266 = vtanh.f32 %v3786_v62  ;;  %v380_v3 = vpop.permute.xlu1 %379 }
 0x1e6   :  { %v3257_v1 = vpop.eup %3256  ;;  %v3791_v4 = vadd.f32 %v380_v3, %v316_v63 }
 0x1e7   :  { %415 = vrot.lane.b32.xlu0 %v3257_v1, %s3540_s3 }
 0x1e8   :  { %3268 = vtanh.f32 %v3791_v4 }
 0x1e9   :  { %v3259_v6 = vpop.eup %3258 }
 0x1ea   :  { %417 = vrot.lane.b32.xlu1 %v3259_v6, %s3540_s3 }
 0x1ed   :  { %v3261_v8 = vpop.eup %3260 }
 0x1ee   :  { %v3263_v11 = vpop.eup %3262  ;;  %419 = vrot.lane.b32.xlu1 %v3261_v8, %s3540_s3 }
 0x1ef   :  { %421 = vrot.lane.b32.xlu0 %v3263_v11, %s3540_s3 }
 0x1f1   :  { %v3265_v13 = vpop.eup %3264 }
 0x1f2   :  { %v3267_v14 = vpop.eup %3266  ;;  %423 = vrot.lane.b32.xlu1 %v3265_v13, %s3540_s3 }
 0x1f3   :  { %425 = vrot.lane.b32.xlu0 %v3267_v14, %s3540_s3 }
 0x1f5   :  { %v3269_v16 = vpop.eup %3268 }
 0x1f6   :  { %427 = vrot.lane.b32.xlu1 %v3269_v16, %s3540_s3 }
 0x255   :  { %v414_v18 = vpop.permute.xlu0 %413 }
 0x256   :  { %v437_v27 = vmul.f32 %v414_v18, %v3729_v60 }
 0x259   :  { %v416_v19 = vpop.permute.xlu0 %415 }
 0x25a   :  { %v438_v20 = vmul.f32 %v416_v19, %v3733_v0 }
 0x25c   :  { %v418_v21 = vpop.permute.xlu1 %417  ;;  %v453_v22 = vrot.slane %v438_v20, 7 }
 0x25d   :  { %v439_v24 = vmul.f32 %v418_v21, %v3736_v10 }
 0x25e   :  { %v455_v31 = vsel %vm454_vm2, %v453_v22, %v437_v27 }
 0x25f   :  { %v456_v28 = vrot.slane %v439_v24, 6 }
 0x260   :  { %v420_v30 = vpop.permute.xlu1 %419 }
 0x261   :  { %v440_v33 = vmul.f32 %v420_v30, %v3740_v15  ;;  %v422_v34 = vpop.permute.xlu0 %421  ;;  %v458_v0 = vsel %vm457_vm3, %v456_v28, %v455_v31 }
 0x262   :  { %v441_v37 = vmul.f32 %v422_v34, %v3743_v17 }
 0x263   :  { %v459_v39 = vrot.slane %v440_v33, 5 }
 0x264   :  { %v462_v40 = vrot.slane %v441_v37, 4  ;;  %v424_v44 = vpop.permute.xlu1 %423 }
 0x265   :  { %v461_v10 = vsel %vm460_vm4, %v459_v39, %v458_v0  ;;  %v442_v60 = vmul.f32 %v424_v44, %v3747_v23  ;;  %v426_v45 = vpop.permute.xlu0 %425 }
 0x266   :  { %v443_v48 = vmul.f32 %v426_v45, %v3751_v25  ;;  %v464_v15 = vsel %vm463_vm5, %v462_v40, %v461_v10 }
 0x267   :  { %v465_v49 = vrot.slane %v442_v60, 3 }
 0x268   :  { %v468_v51 = vrot.slane %v443_v48, 2  ;;  %v428_v52 = vpop.permute.xlu1 %427 }
 0x269   :  { %v444_v17 = vmul.f32 %v428_v52, %v3755_v32  ;;  %v467_v53 = vsel %vm466_vm6, %v465_v49, %v464_v15 }
 0x26a   :  { %v470_v57 = vsel %vm469_vm7, %v468_v51, %v467_v53 }
 0x26b   :  { %v471_v56 = vrot.slane %v444_v17, 1 }
 0x26d   :  { %v473_v23 = vsel %vm472_vm8, %v471_v56, %v470_v57 }
 0x26e   :  { %474 = vrot.lane.b32.xlu0 %v473_v23, %s3541_s25 }
 0x2e0   :  { %v475_v25 = vpop.permute.xlu0 %474 }
 0x2e1   :  { %3109 = vmatmul.mubr.msk.f32.vlgmr.msra.gmra.mxu1 %vm54_vm0, %v475_v25 }
 0x2e2   :  { %3123 = vmatpush3.msra.mxu1 %v3616_v5  ;;  %3130 = vmatprep.mubr.msk.f32.mxu1 %vm3539_vm1, %v3538_v2 }
 0x2e3   :  { %3124 = vmatprep.subr.mxu1 %v3538_v2 }
 0x2e4   :  { %3125 = vmatpush3.msra.mxu1 %v3625_v7 }
 0x2e5   :  { %3126 = vmatprep.subr.mxu1 %v3538_v2 }
 0x2e6   :  { %3127 = vmatpush3.msra.mxu1 %v3635_v9 }
 0x2e7   :  { %3128 = vmatprep.subr.mxu1 %v3538_v2 }
 0x2e8   :  { %3129 = vmatpush3.msra.mxu1 %v3653_v12 }
 0x2e9   :  { %3144 = vmatprep.subr.mxu1 %v3538_v2 }
 0x3a1   :  { %v544_v32 = vpop.f32.mrf.mxu1 }
 0x3a2   :  { %v549_v58 = vrot.slane %v544_v32, 7  ;;  %v550_v59 = vrot.slane %v544_v32, 1  ;;  %v551_v63 = vrot.slane %v544_v32, 2  ;;  %v565_v1 = vadd.f32 %v544_v32, %v3703_v35 }
 0x3a3   :  { %v3110_v3 = vpop.f32.mrf.mxu1  ;;  %v552_v8 = vrot.slane %v544_v32, 3  ;;  %v553_v13 = vrot.slane %v544_v32, 4  ;;  %v554_v16 = vrot.slane %v544_v32, 5  ;;  %v555_v19 = vrot.slane %v544_v32, 6 }
 0x3a4   :  { %v566_v6 = vadd.f32 %v550_v59, %v3709_v41  ;;  %v564_v11 = vadd.f32 %v549_v58, %v3697_v26  ;;  %3270 = vtanh.f32 %v565_v1  ;;  %v567_v14 = vadd.f32 %v551_v63, %v3699_v29 }
 0x3a5   :  { %v568_v18 = vadd.f32 %v552_v8, %v3715_v46  ;;  %v569_v20 = vadd.f32 %v553_v13, %v3705_v36  ;;  %v570_v21 = vadd.f32 %v554_v16, %v3718_v50  ;;  %v571_v22 = vadd.f32 %v555_v19, %v3711_v42 }
 0x3a6   :  { %3272 = vtanh.f32 %v566_v6 }
 0x3a7   :  { %3274 = vtanh.f32 %v564_v11 }
 0x3a8   :  { %3276 = vtanh.f32 %v567_v14 }
 0x3a9   :  { %3278 = vtanh.f32 %v568_v18 }
 0x3aa   :  { %3280 = vtanh.f32 %v569_v20  ;;  %v605_v20 = vrot.slane %v3766_v43, 7 }
 0x3ab   :  { %3282 = vtanh.f32 %v570_v21  ;;  %v606_v21 = vrot.slane %v3770_v47, 7  ;;  %v608_v47 = vrot.slane %v3777_v55, 7 }
 0x3ac   :  { %3284 = vtanh.f32 %v571_v22 }
 0x3b1   :  { %v3271_v24 = vpop.eup %3270 }
 0x3b2   :  { %638 = vrot.lane.b32.xlu1 %v3271_v24, %s3540_s3  ;;  %v581_v39 = vmul.f32 0.5, %v3271_v24 }
 0x3b3   :  { %v3273_v27 = vpop.eup %3272 }
 0x3b4   :  { %640 = vrot.lane.b32.xlu0 %v3273_v27, %s3540_s3  ;;  %v3275_v28 = vpop.eup %3274  ;;  %v582_v0 = vmul.f32 0.5, %v3273_v27  ;;  %v3844_v40 = vadd.f32 0.5, %v581_v39  ;;  %v604_v27 = vrot.slane %v3762_v38, 7 }
 0x3b5   :  { %v3277_v30 = vpop.eup %3276  ;;  %v580_v44 = vmul.f32 0.5, %v3275_v28 }
 0x3b6   :  { %636 = vrot.lane.b32.xlu1 %v3275_v28, %s3540_s3  ;;  %v3279_v31 = vpop.eup %3278  ;;  %v3847_v45 = vadd.f32 0.5, %v582_v0  ;;  %v583_v48 = vmul.f32 0.5, %v3277_v30  ;;  %v621_v22 = vmul.f32 %v605_v20, %v3844_v40 }
 0x3b7   :  { %v3281_v33 = vpop.eup %3280  ;;  %v3851_v51 = vadd.f32 0.5, %v580_v44  ;;  %v584_v52 = vmul.f32 0.5, %v3279_v31  ;;  %v609_v44 = vrot.slane %v3784_v61, 7 }
 0x3b8   :  { %642 = vrot.lane.b32.xlu0 %v3277_v30, %s3540_s3  ;;  %v3283_v34 = vpop.eup %3282  ;;  %v3855_v56 = vadd.f32 0.5, %v583_v48  ;;  %v585_v57 = vmul.f32 0.5, %v3281_v33  ;;  %v622_v30 = vmul.f32 %v606_v21, %v3847_v45  ;;  %v610_v48 = vrot.slane %v3786_v62, 7 }
 0x3b9   :  { %v3285_v37 = vpop.eup %3284  ;;  %v3859_v32 = vadd.f32 0.5, %v584_v52  ;;  %v586_v58 = vmul.f32 0.5, %v3283_v34  ;;  %v620_v43 = vmul.f32 %v604_v27, %v3851_v51  ;;  %v611_v52 = vrot.slane %v3791_v4, 7 }
 0x3ba   :  { %644 = vrot.lane.b32.xlu1 %v3279_v31, %s3540_s3  ;;  %v3863_v1 = vadd.f32 0.5, %v585_v57  ;;  %v587_v3 = vmul.f32 0.5, %v3285_v37 }
 0x3bb   :  { %v3867_v11 = vadd.f32 0.5, %v586_v58 }
 0x3bc   :  { %646 = vrot.lane.b32.xlu0 %v3281_v33, %s3540_s3  ;;  %v3871_v16 = vadd.f32 0.5, %v587_v3  ;;  %v607_v33 = vrot.slane %v3775_v54, 7 }
 0x3be   :  { %648 = vrot.lane.b32.xlu1 %v3283_v34, %s3540_s3  ;;  %v623_v38 = vmul.f32 %v607_v33, %v3855_v56  ;;  %v627_v62 = vmul.f32 %v611_v52, %v3871_v16 }
 0x3c0   :  { %650 = vrot.lane.b32.xlu0 %v3285_v37, %s3540_s3 }
 0x424   :  { %v639_v10 = vpop.permute.xlu1 %638 }
 0x425   :  { %v661_v60 = vmul.f32 %v639_v10, %v3844_v40  ;;  %v624_v10 = vmul.f32 %v608_v47, %v3859_v32 }
 0x426   :  { %v641_v49 = vpop.permute.xlu0 %640 }
 0x427   :  { %v662_v15 = vmul.f32 %v641_v49, %v3847_v45  ;;  %678 = vrot.lane.b32.xlu1 %v661_v60, %s3541_s25  ;;  %v625_v49 = vmul.f32 %v609_v44, %v3863_v1 }
 0x428   :  { %v637_v17 = vpop.permute.xlu1 %636 }
 0x429   :  { %v660_v53 = vmul.f32 %v637_v17, %v3851_v51  ;;  %680 = vrot.lane.b32.xlu0 %v662_v15, %s3541_s25  ;;  %v626_v17 = vmul.f32 %v610_v48, %v3867_v11 }
 0x42a   :  { %v643_v23 = vpop.permute.xlu0 %642 }
 0x42b   :  { %v663_v25 = vmul.f32 %v643_v23, %v3855_v56  ;;  %676 = vrot.lane.b32.xlu1 %v660_v53, %s3541_s25 }
 0x42c   :  { %v645_v59 = vpop.permute.xlu1 %644 }
 0x42d   :  { %v664_v63 = vmul.f32 %v645_v59, %v3859_v32  ;;  %682 = vrot.lane.b32.xlu0 %v663_v25, %s3541_s25 }
 0x42e   :  { %v647_v6 = vpop.permute.xlu0 %646 }
 0x42f   :  { %v665_v8 = vmul.f32 %v647_v6, %v3863_v1  ;;  %684 = vrot.lane.b32.xlu1 %v664_v63, %s3541_s25 }
 0x430   :  { %v649_v13 = vpop.permute.xlu1 %648 }
 0x431   :  { %v666_v14 = vmul.f32 %v649_v13, %v3867_v11  ;;  %686 = vrot.lane.b32.xlu0 %v665_v8, %s3541_s25 }
 0x432   :  { %v651_v18 = vpop.permute.xlu0 %650 }
 0x433   :  { %v667_v19 = vmul.f32 %v651_v18, %v3871_v16  ;;  %688 = vrot.lane.b32.xlu1 %v666_v14, %s3541_s25 }
 0x435   :  { %690 = vrot.lane.b32.xlu0 %v667_v19, %s3541_s25 }
 0x499   :  { %v679_v24 = vpop.permute.xlu1 %678 }
 0x49a   :  { %v3880_v28 = vadd.f32 %v679_v24, %v621_v22 }
 0x49b   :  { %v681_v31 = vpop.permute.xlu0 %680 }
 0x49c   :  { %3286 = vtanh.f32 %v3880_v28  ;;  %v3885_v34 = vadd.f32 %v681_v31, %v622_v30 }
 0x49d   :  { %v677_v37 = vpop.permute.xlu1 %676 }
 0x49e   :  { %3288 = vtanh.f32 %v3885_v34  ;;  %v3890_v39 = vadd.f32 %v677_v37, %v620_v43 }
 0x49f   :  { %v683_v0 = vpop.permute.xlu0 %682 }
 0x4a0   :  { %3290 = vtanh.f32 %v3890_v39  ;;  %v3895_v54 = vadd.f32 %v683_v0, %v623_v38 }
 0x4a1   :  { %v685_v60 = vpop.permute.xlu1 %684 }
 0x4a2   :  { %3292 = vtanh.f32 %v3895_v54  ;;  %v3900_v55 = vadd.f32 %v685_v60, %v624_v10 }
 0x4a3   :  { %v687_v15 = vpop.permute.xlu0 %686 }
 0x4a4   :  { %3294 = vtanh.f32 %v3900_v55  ;;  %v3905_v61 = vadd.f32 %v687_v15, %v625_v49 }
 0x4a5   :  { %v689_v53 = vpop.permute.xlu1 %688 }
 0x4a6   :  { %3296 = vtanh.f32 %v3905_v61  ;;  %v3909_v57 = vadd.f32 %v689_v53, %v626_v17 }
 0x4a7   :  { %v691_v23 = vpop.permute.xlu0 %690 }
 0x4a8   :  { %3298 = vtanh.f32 %v3909_v57  ;;  %v3913_v25 = vadd.f32 %v691_v23, %v627_v62 }
 0x4a9   :  { %v3287_v58 = vpop.eup %3286 }
 0x4aa   :  { %3300 = vtanh.f32 %v3913_v25  ;;  %726 = vrot.lane.b32.xlu1 %v3287_v58, %s3540_s3 }
 0x4ab   :  { %v3289_v4 = vpop.eup %3288 }
 0x4ac   :  { %728 = vrot.lane.b32.xlu0 %v3289_v4, %s3540_s3 }
 0x4ad   :  { %v3291_v59 = vpop.eup %3290 }
 0x4ae   :  { %724 = vrot.lane.b32.xlu1 %v3291_v59, %s3540_s3 }
 0x4af   :  { %v3293_v63 = vpop.eup %3292 }
 0x4b0   :  { %730 = vrot.lane.b32.xlu0 %v3293_v63, %s3540_s3 }
 0x4b1   :  { %v3295_v3 = vpop.eup %3294 }
 0x4b2   :  { %732 = vrot.lane.b32.xlu1 %v3295_v3, %s3540_s3 }
 0x4b3   :  { %v3297_v6 = vpop.eup %3296 }
 0x4b4   :  { %734 = vrot.lane.b32.xlu0 %v3297_v6, %s3540_s3 }
 0x4b5   :  { %v3299_v8 = vpop.eup %3298 }
 0x4b6   :  { %736 = vrot.lane.b32.xlu1 %v3299_v8, %s3540_s3 }
 0x4b7   :  { %v3301_v13 = vpop.eup %3300 }
 0x4b8   :  { %738 = vrot.lane.b32.xlu0 %v3301_v13, %s3540_s3 }
 0x51c   :  { %v727_v14 = vpop.permute.xlu1 %726 }
 0x51d   :  { %v749_v24 = vmul.f32 %v727_v14, %v3844_v40 }
 0x51e   :  { %v729_v18 = vpop.permute.xlu0 %728 }
 0x51f   :  { %v750_v19 = vmul.f32 %v729_v18, %v3847_v45 }
 0x520   :  { %v725_v20 = vpop.permute.xlu1 %724 }
 0x521   :  { %v748_v21 = vmul.f32 %v725_v20, %v3851_v51  ;;  %v766_v31 = vrot.slane %v750_v19, 7 }
 0x522   :  { %v731_v22 = vpop.permute.xlu0 %730 }
 0x523   :  { %v764_v27 = vrot.slane %v748_v21, 1  ;;  %v751_v30 = vmul.f32 %v731_v22, %v3855_v56 }
 0x524   :  { %v733_v33 = vpop.permute.xlu1 %732 }
 0x525   :  { %v765_v43 = vsel %vm454_vm2, %v749_v24, %v764_v27  ;;  %v768_v37 = vrot.slane %v751_v30, 6  ;;  %v752_v47 = vmul.f32 %v733_v33, %v3859_v32 }
 0x526   :  { %v767_v38 = vsel %vm457_vm3, %v766_v31, %v765_v43  ;;  %v735_v0 = vpop.permute.xlu0 %734 }
 0x527   :  { %v769_v45 = vsel %vm460_vm4, %v768_v37, %v767_v38  ;;  %v770_v44 = vrot.slane %v752_v47, 5  ;;  %v753_v51 = vmul.f32 %v735_v0, %v3863_v1 }
 0x528   :  { %v737_v10 = vpop.permute.xlu1 %736 }
 0x529   :  { %v771_v40 = vsel %vm463_vm5, %v770_v44, %v769_v45  ;;  %v772_v60 = vrot.slane %v753_v51, 4  ;;  %v754_v56 = vmul.f32 %v737_v10, %v3867_v11 }
 0x52a   :  { %v739_v48 = vpop.permute.xlu0 %738 }
 0x52b   :  { %v774_v49 = vrot.slane %v754_v56, 3  ;;  %v755_v15 = vmul.f32 %v739_v48, %v3871_v16  ;;  %v773_v32 = vsel %vm466_vm6, %v772_v60, %v771_v40 }
 0x52d   :  { %v776_v52 = vrot.slane %v755_v15, 2  ;;  %v775_v17 = vsel %vm469_vm7, %v774_v49, %v773_v32 }
 0x52f   :  { %v777_v53 = vsel %vm472_vm8, %v776_v52, %v775_v17 }
 0x530   :  { %778 = vrot.lane.b32.xlu1 %v777_v53, %s3541_s25 }
 0x5a2   :  { %v779_v1 = vpop.permute.xlu1 %778 }
 0x5a3   :  { %3120 = vmatmul.mubr.msk.f32.vlgmr.msra.gmra.mxu0 %vm54_vm0, %v779_v1 }
 0x5a4   :  { %3134 = vmatpush3.msra.mxu0 %v3616_v5  ;;  %3141 = vmatprep.mubr.msk.f32.mxu0 %vm3539_vm1, %v3538_v2 }
 0x5a5   :  { %3135 = vmatprep.subr.mxu0 %v3538_v2 }
 0x5a6   :  { %3136 = vmatpush3.msra.mxu0 %v3625_v7 }
 0x5a7   :  { %3137 = vmatprep.subr.mxu0 %v3538_v2 }
 0x5a8   :  { %3138 = vmatpush3.msra.mxu0 %v3635_v9 }
 0x5a9   :  { %3139 = vmatprep.subr.mxu0 %v3538_v2 }
 0x5aa   :  { %3140 = vmatpush3.msra.mxu0 %v3653_v12 }
 0x5ab   :  { %3155 = vmatprep.subr.mxu0 %v3538_v2 }
 0x663   :  { %v848_v11 = vpop.f32.mrf.mxu0 }
 0x664   :  { %v853_v16 = vrot.slane %v848_v11, 6  ;;  %v854_v5 = vrot.slane %v848_v11, 7  ;;  %v855_v62 = vrot.slane %v848_v11, 1  ;;  %v870_v23 = vadd.f32 %v848_v11, %v3709_v41 }
 0x665   :  { %v3121_v58 = vpop.f32.mrf.mxu0  ;;  %v857_v7 = vrot.slane %v848_v11, 3  ;;  %v856_v9 = vrot.slane %v848_v11, 2  ;;  %v859_v12 = vrot.slane %v848_v11, 5  ;;  %v858_v6 = vrot.slane %v848_v11, 4 }
 0x666   :  { %v868_v4 = vadd.f32 %v853_v16, %v3697_v26  ;;  %v869_v59 = vadd.f32 %v854_v5, %v3703_v35  ;;  %3302 = vtanh.f32 %v870_v23  ;;  %v871_v63 = vadd.f32 %v855_v62, %v3699_v29 }
 0x667   :  { %v873_v3 = vadd.f32 %v857_v7, %v3705_v36  ;;  %v872_v8 = vadd.f32 %v856_v9, %v3715_v46  ;;  %v875_v13 = vadd.f32 %v859_v12, %v3711_v42  ;;  %v874_v14 = vadd.f32 %v858_v6, %v3718_v50 }
 0x668   :  { %3304 = vtanh.f32 %v868_v4  ;;  %v908_v12 = vrot.slane %v3890_v39, 7 }
 0x669   :  { %3306 = vtanh.f32 %v869_v59 }
 0x66a   :  { %3308 = vtanh.f32 %v871_v63  ;;  %v910_v63 = vrot.slane %v3885_v34, 7 }
 0x66b   :  { %3310 = vtanh.f32 %v873_v3 }
 0x66c   :  { %3312 = vtanh.f32 %v872_v8 }
 0x66d   :  { %3314 = vtanh.f32 %v875_v13  ;;  %v909_v13 = vrot.slane %v3880_v28, 7 }
 0x66e   :  { %3316 = vtanh.f32 %v874_v14 }
 0x673   :  { %v3303_v18 = vpop.eup %3302 }
 0x674   :  { %944 = vrot.lane.b32.xlu1 %v3303_v18, %s3540_s3  ;;  %v886_v31 = vmul.f32 0.5, %v3303_v18 }
 0x675   :  { %v3305_v19 = vpop.eup %3304 }
 0x676   :  { %940 = vrot.lane.b32.xlu0 %v3305_v19, %s3540_s3  ;;  %v3307_v20 = vpop.eup %3306  ;;  %v884_v33 = vmul.f32 0.5, %v3305_v19  ;;  %v3967_v43 = vadd.f32 0.5, %v886_v31  ;;  %v911_v19 = vrot.slane %v3895_v54, 7 }
 0x677   :  { %v3309_v21 = vpop.eup %3308  ;;  %v885_v37 = vmul.f32 0.5, %v3307_v20 }
 0x678   :  { %942 = vrot.lane.b32.xlu1 %v3307_v20, %s3540_s3  ;;  %v3311_v22 = vpop.eup %3310  ;;  %v3969_v38 = vadd.f32 0.5, %v884_v33  ;;  %v887_v0 = vmul.f32 0.5, %v3309_v21  ;;  %v926_v3 = vmul.f32 %v910_v63, %v3967_v43 }
 0x679   :  { %v3313_v24 = vpop.eup %3312  ;;  %v3974_v10 = vadd.f32 0.5, %v885_v37  ;;  %v889_v40 = vmul.f32 0.5, %v3311_v22  ;;  %v915_v37 = vrot.slane %v3913_v25, 7 }
 0x67a   :  { %946 = vrot.lane.b32.xlu0 %v3309_v21, %s3540_s3  ;;  %v3315_v27 = vpop.eup %3314  ;;  %v3977_v56 = vadd.f32 0.5, %v887_v0  ;;  %v888_v48 = vmul.f32 0.5, %v3313_v24  ;;  %v924_v8 = vmul.f32 %v908_v12, %v3969_v38  ;;  %v914_v0 = vrot.slane %v3909_v57, 7 }
 0x67b   :  { %v3317_v30 = vpop.eup %3316  ;;  %v3982_v52 = vadd.f32 0.5, %v889_v40  ;;  %v891_v17 = vmul.f32 0.5, %v3315_v27  ;;  %v925_v34 = vmul.f32 %v909_v13, %v3974_v10 }
 0x67c   :  { %950 = vrot.lane.b32.xlu1 %v3311_v22, %s3540_s3  ;;  %v3985_v1 = vadd.f32 0.5, %v888_v48  ;;  %v890_v11 = vmul.f32 0.5, %v3317_v30  ;;  %v927_v21 = vmul.f32 %v911_v19, %v3977_v56  ;;  %v913_v22 = vrot.slane %v3905_v61, 7 }
 0x67d   :  { %v3990_v23 = vadd.f32 0.5, %v891_v17 }
 0x67e   :  { %948 = vrot.lane.b32.xlu0 %v3313_v24, %s3540_s3  ;;  %v3993_v4 = vadd.f32 0.5, %v890_v11  ;;  %v929_v54 = vmul.f32 %v913_v22, %v3982_v52 }
 0x680   :  { %954 = vrot.lane.b32.xlu1 %v3315_v27, %s3540_s3  ;;  %v912_v27 = vrot.slane %v3900_v55, 7  ;;  %v931_v55 = vmul.f32 %v915_v37, %v3990_v23 }
 0x682   :  { %952 = vrot.lane.b32.xlu0 %v3317_v30, %s3540_s3  ;;  %v928_v33 = vmul.f32 %v912_v27, %v3985_v1 }
 0x6e6   :  { %v945_v47 = vpop.permute.xlu1 %944 }
 0x6e7   :  { %v966_v45 = vmul.f32 %v945_v47, %v3967_v43 }
 0x6e8   :  { %v941_v44 = vpop.permute.xlu0 %940 }
 0x6e9   :  { %v964_v51 = vmul.f32 %v941_v44, %v3969_v38  ;;  %984 = vrot.lane.b32.xlu1 %v966_v45, %s3541_s25 }
 0x6ea   :  { %v943_v60 = vpop.permute.xlu1 %942 }
 0x6eb   :  { %980 = vrot.lane.b32.xlu0 %v964_v51, %s3541_s25  ;;  %v965_v49 = vmul.f32 %v943_v60, %v3974_v10  ;;  %v930_v51 = vmul.f32 %v914_v0, %v3993_v4  ;;  %v4090_v0 = vld [vmem:[%s4784_s2] sm:$0xff] }
 0x6ec   :  { %v947_v15 = vpop.permute.xlu0 %946 }
 0x6ed   :  { %v967_v32 = vmul.f32 %v947_v15, %v3977_v56  ;;  %982 = vrot.lane.b32.xlu1 %v965_v49, %s3541_s25 }
 0x6ee   :  { %v951_v53 = vpop.permute.xlu1 %950 }
 0x6ef   :  { %986 = vrot.lane.b32.xlu0 %v967_v32, %s3541_s25  ;;  %v969_v16 = vmul.f32 %v951_v53, %v3982_v52 }
 0x6f0   :  { %v949_v5 = vpop.permute.xlu0 %948 }
 0x6f1   :  { %v968_v62 = vmul.f32 %v949_v5, %v3985_v1  ;;  %990 = vrot.lane.b32.xlu1 %v969_v16, %s3541_s25 }
 0x6f2   :  { %v955_v58 = vpop.permute.xlu1 %954 }
 0x6f3   :  { %988 = vrot.lane.b32.xlu0 %v968_v62, %s3541_s25  ;;  %v971_v7 = vmul.f32 %v955_v58, %v3990_v23 }
 0x6f4   :  { %v953_v59 = vpop.permute.xlu0 %952 }
 0x6f5   :  { %v970_v9 = vmul.f32 %v953_v59, %v3993_v4  ;;  %994 = vrot.lane.b32.xlu1 %v971_v7, %s3541_s25 }
 0x6f7   :  { %992 = vrot.lane.b32.xlu0 %v970_v9, %s3541_s25 }
 0x75b   :  { %v985_v6 = vpop.permute.xlu1 %984 }
 0x75c   :  { %v4004_v14 = vadd.f32 %v985_v6, %v926_v3 }
 0x75d   :  { %v981_v18 = vpop.permute.xlu0 %980 }
 0x75e   :  { %v4007_v20 = vadd.f32 %v981_v18, %v924_v8  ;;  %3318 = vtanh.f32 %v4004_v14 }
 0x75f   :  { %v983_v39 = vpop.permute.xlu1 %982 }
 0x760   :  { %3320 = vtanh.f32 %v4007_v20  ;;  %v4014_v24 = vadd.f32 %v983_v39, %v925_v34 }
 0x761   :  { %v987_v28 = vpop.permute.xlu0 %986 }
 0x762   :  { %v4017_v30 = vadd.f32 %v987_v28, %v927_v21  ;;  %3322 = vtanh.f32 %v4014_v24 }
 0x763   :  { %v991_v31 = vpop.permute.xlu1 %990 }
 0x764   :  { %3324 = vtanh.f32 %v4017_v30  ;;  %v4024_v47 = vadd.f32 %v991_v31, %v929_v54 }
 0x765   :  { %v989_v61 = vpop.permute.xlu0 %988 }
 0x766   :  { %v4027_v45 = vadd.f32 %v989_v61, %v928_v33  ;;  %3326 = vtanh.f32 %v4024_v47  ;;  %v4083_v61 = vld [vmem:[%s4784_s2 + $0x8] sm:$0xff] }
 0x767   :  { %v995_v44 = vpop.permute.xlu1 %994 }
 0x768   :  { %3328 = vtanh.f32 %v4027_v45  ;;  %v4033_v40 = vadd.f32 %v995_v44, %v931_v55 }
 0x769   :  { %v993_v60 = vpop.permute.xlu0 %992 }
 0x76a   :  { %v4035_v25 = vadd.f32 %v993_v60, %v930_v51  ;;  %3330 = vtanh.f32 %v4033_v40 }
 0x76b   :  { %v3319_v48 = vpop.eup %3318 }
 0x76c   :  { %3332 = vtanh.f32 %v4035_v25  ;;  %1032 = vrot.lane.b32.xlu1 %v3319_v48, %s3540_s3 }
 0x76d   :  { %v3321_v57 = vpop.eup %3320 }
 0x76e   :  { %1028 = vrot.lane.b32.xlu0 %v3321_v57, %s3540_s3 }
 0x76f   :  { %v3323_v49 = vpop.eup %3322 }
 0x770   :  { %1030 = vrot.lane.b32.xlu1 %v3323_v49, %s3540_s3 }
 0x771   :  { %v3325_v15 = vpop.eup %3324 }
 0x772   :  { %1034 = vrot.lane.b32.xlu0 %v3325_v15, %s3540_s3 }
 0x773   :  { %v3327_v32 = vpop.eup %3326 }
 0x774   :  { %1038 = vrot.lane.b32.xlu1 %v3327_v32, %s3540_s3 }
 0x775   :  { %v3329_v17 = vpop.eup %3328 }
 0x776   :  { %1036 = vrot.lane.b32.xlu0 %v3329_v17, %s3540_s3 }
 0x777   :  { %v3331_v53 = vpop.eup %3330 }
 0x778   :  { %1042 = vrot.lane.b32.xlu1 %v3331_v53, %s3540_s3 }
 0x779   :  { %v3333_v11 = vpop.eup %3332 }
 0x77a   :  { %1040 = vrot.lane.b32.xlu0 %v3333_v11, %s3540_s3 }
 0x7de   :  { %v1033_v16 = vpop.permute.xlu1 %1032 }
 0x7df   :  { %v1054_v3 = vmul.f32 %v1033_v16, %v3967_v43 }
 0x7e0   :  { %v1029_v5 = vpop.permute.xlu0 %1028 }
 0x7e1   :  { %v1052_v62 = vmul.f32 %v1029_v5, %v3969_v38 }
 0x7e2   :  { %v1031_v58 = vpop.permute.xlu1 %1030 }
 0x7e3   :  { %v1053_v7 = vmul.f32 %v1031_v58, %v3974_v10  ;;  %v1068_v63 = vrot.slane %v1052_v62, 2 }
 0x7e4   :  { %v1035_v59 = vpop.permute.xlu0 %1034 }
 0x7e5   :  { %v1055_v9 = vmul.f32 %v1035_v59, %v3977_v56  ;;  %v1069_v12 = vrot.slane %v1053_v7, 1 }
 0x7e6   :  { %v1039_v6 = vpop.permute.xlu1 %1038 }
 0x7e7   :  { %v1070_v8 = vsel %vm454_vm2, %v1069_v12, %v1068_v63  ;;  %v1072_v13 = vrot.slane %v1055_v9, 7  ;;  %v1057_v38 = vmul.f32 %v1039_v6, %v3982_v52 }
 0x7e8   :  { %v1037_v18 = vpop.permute.xlu0 %1036  ;;  %v1071_v19 = vsel %vm457_vm3, %v1054_v3, %v1070_v8 }
 0x7e9   :  { %v1056_v34 = vmul.f32 %v1037_v18, %v3985_v1  ;;  %v1073_v21 = vsel %vm460_vm4, %v1072_v13, %v1071_v19  ;;  %v1076_v27 = vrot.slane %v1057_v38, 5 }
 0x7ea   :  { %v1043_v10 = vpop.permute.xlu1 %1042 }
 0x7eb   :  { %v1074_v39 = vrot.slane %v1056_v34, 6  ;;  %v1059_v56 = vmul.f32 %v1043_v10, %v3990_v23  ;;  %v4067_v23 = vld [vmem:[%s4784_s2 + $0x18] sm:$0xff] }
 0x7ec   :  { %v1041_v22 = vpop.permute.xlu0 %1040 }
 0x7ed   :  { %v1075_v43 = vsel %vm463_vm5, %v1074_v39, %v1073_v21  ;;  %v1058_v28 = vmul.f32 %v1041_v22, %v3993_v4  ;;  %v1080_v31 = vrot.slane %v1059_v56, 3  ;;  %v4076_v4 = vld [vmem:[%s4784_s2 + $0x10] sm:$0xff] }
 0x7ee   :  { %v1077_v33 = vsel %vm466_vm6, %v1076_v27, %v1075_v43 }
 0x7ef   :  { %v1078_v54 = vrot.slane %v1058_v28, 4 }
 0x7f1   :  { %v1079_v1 = vsel %vm469_vm7, %v1078_v54, %v1077_v33 }
 0x7f2   :  { %v1081_v52 = vsel %vm472_vm8, %v1080_v31, %v1079_v1 }
 0x7f3   :  { %1082 = vrot.lane.b32.xlu0 %v1081_v52, %s3541_s25 }
 0x865   :  { %v1083_v37 = vpop.permute.xlu0 %1082 }
 0x866   :  { %3131 = vmatmul.mubr.msk.f32.vlgmr.msra.gmra.mxu1 %vm54_vm0, %v1083_v37 }
 0x867   :  { %3145 = vmatpush3.msra.mxu1 %v4067_v23  ;;  %3152 = vmatprep.mubr.msk.f32.mxu1 %vm3539_vm1, %v3538_v2 }
 0x868   :  { %3146 = vmatprep.subr.mxu1 %v3538_v2 }
 0x869   :  { %3147 = vmatpush3.msra.mxu1 %v4076_v4 }
 0x86a   :  { %3148 = vmatprep.subr.mxu1 %v3538_v2 }
 0x86b   :  { %3149 = vmatpush3.msra.mxu1 %v4083_v61 }
 0x86c   :  { %3150 = vmatprep.subr.mxu1 %v3538_v2 }
 0x86d   :  { %3151 = vmatpush3.msra.mxu1 %v4090_v0 }
 0x86e   :  { %3166 = vmatprep.subr.mxu1 %v3538_v2 }
 0x926   :  { %v1152_v55 = vpop.f32.mrf.mxu1 }
 0x927   :  { %v1157_v44 = vrot.slane %v1152_v55, 5  ;;  %v1158_v51 = vrot.slane %v1152_v55, 6  ;;  %v1160_v60 = vrot.slane %v1152_v55, 1  ;;  %v1175_v48 = vadd.f32 %v1152_v55, %v3699_v29 }
 0x928   :  { %v3132_v57 = vpop.f32.mrf.mxu1  ;;  %v1159_v15 = vrot.slane %v1152_v55, 7  ;;  %v1161_v17 = vrot.slane %v1152_v55, 2  ;;  %v1162_v11 = vrot.slane %v1152_v55, 3  ;;  %v1163_v5 = vrot.slane %v1152_v55, 4 }
 0x929   :  { %v1173_v49 = vadd.f32 %v1158_v51, %v3703_v35  ;;  %v1172_v32 = vadd.f32 %v1157_v44, %v3697_v26  ;;  %3334 = vtanh.f32 %v1175_v48  ;;  %v1176_v53 = vadd.f32 %v1160_v60, %v3715_v46 }
 0x92a   :  { %v1174_v16 = vadd.f32 %v1159_v15, %v3709_v41  ;;  %v1177_v62 = vadd.f32 %v1161_v17, %v3705_v36  ;;  %v1178_v58 = vadd.f32 %v1162_v11, %v3718_v50  ;;  %v1179_v7 = vadd.f32 %v1163_v5, %v3711_v42 }
 0x92b   :  { %3336 = vtanh.f32 %v1173_v49 }
 0x92c   :  { %3338 = vtanh.f32 %v1172_v32 }
 0x92d   :  { %3340 = vtanh.f32 %v1176_v53 }
 0x92e   :  { %3342 = vtanh.f32 %v1174_v16 }
 0x92f   :  { %3344 = vtanh.f32 %v1177_v62  ;;  %v1215_v62 = vrot.slane %v4017_v30, 7 }
 0x930   :  { %3346 = vtanh.f32 %v1178_v58  ;;  %v1213_v58 = vrot.slane %v4014_v24, 7  ;;  %v1214_v24 = vrot.slane %v4004_v14, 7 }
 0x931   :  { %3348 = vtanh.f32 %v1179_v7 }
 0x936   :  { %v3335_v59 = vpop.eup %3334 }
 0x937   :  { %1250 = vrot.lane.b32.xlu1 %v3335_v59, %s3540_s3  ;;  %v1191_v18 = vmul.f32 0.5, %v3335_v59 }
 0x938   :  { %v3337_v9 = vpop.eup %3336 }
 0x939   :  { %1246 = vrot.lane.b32.xlu0 %v3337_v9, %s3540_s3  ;;  %v3339_v63 = vpop.eup %3338  ;;  %v1189_v19 = vmul.f32 0.5, %v3337_v9  ;;  %v4110_v34 = vadd.f32 0.5, %v1191_v18  ;;  %v1212_v9 = vrot.slane %v4007_v20, 7 }
 0x93a   :  { %v3341_v12 = vpop.eup %3340  ;;  %v1188_v38 = vmul.f32 0.5, %v3339_v63 }
 0x93b   :  { %1244 = vrot.lane.b32.xlu1 %v3339_v63, %s3540_s3  ;;  %v3343_v3 = vpop.eup %3342  ;;  %v4113_v21 = vadd.f32 0.5, %v1189_v19  ;;  %v1192_v56 = vmul.f32 0.5, %v3341_v12  ;;  %v1231_v7 = vmul.f32 %v1215_v62, %v4110_v34 }
 0x93c   :  { %v3345_v6 = vpop.eup %3344  ;;  %v4117_v28 = vadd.f32 0.5, %v1188_v38  ;;  %v1190_v27 = vmul.f32 0.5, %v3343_v3  ;;  %v1217_v38 = vrot.slane %v4024_v47, 7 }
 0x93d   :  { %1252 = vrot.lane.b32.xlu0 %v3341_v12, %s3540_s3  ;;  %v3347_v8 = vpop.eup %3346  ;;  %v4121_v33 = vadd.f32 0.5, %v1192_v56  ;;  %v1193_v1 = vmul.f32 0.5, %v3345_v6  ;;  %v1229_v12 = vmul.f32 %v1213_v58, %v4113_v21  ;;  %v1218_v56 = vrot.slane %v4035_v25, 7 }
 0x93e   :  { %v3349_v13 = vpop.eup %3348  ;;  %v4125_v55 = vadd.f32 0.5, %v1190_v27  ;;  %v1194_v44 = vmul.f32 0.5, %v3347_v8  ;;  %v1228_v30 = vmul.f32 %v1212_v9, %v4117_v28  ;;  %v1219_v27 = vrot.slane %v4033_v40, 7 }
 0x93f   :  { %1248 = vrot.lane.b32.xlu1 %v3343_v3, %s3540_s3  ;;  %v4129_v48 = vadd.f32 0.5, %v1193_v1  ;;  %v1195_v57 = vmul.f32 0.5, %v3349_v13 }
 0x940   :  { %v4133_v32 = vadd.f32 0.5, %v1194_v44 }
 0x941   :  { %1254 = vrot.lane.b32.xlu0 %v3345_v6, %s3540_s3  ;;  %v4137_v11 = vadd.f32 0.5, %v1195_v57  ;;  %v1216_v6 = vrot.slane %v4027_v45, 7 }
 0x943   :  { %1256 = vrot.lane.b32.xlu1 %v3347_v8, %s3540_s3  ;;  %v1232_v20 = vmul.f32 %v1216_v6, %v4121_v33  ;;  %v1235_v25 = vmul.f32 %v1219_v27, %v4137_v11 }
 0x945   :  { %1258 = vrot.lane.b32.xlu0 %v3349_v13, %s3540_s3 }
 0x9a9   :  { %v1251_v39 = vpop.permute.xlu1 %1250 }
 0x9aa   :  { %v1271_v10 = vmul.f32 %v1251_v39, %v4110_v34  ;;  %v1230_v39 = vmul.f32 %v1214_v24, %v4125_v55 }
 0x9ab   :  { %v1247_v22 = vpop.permute.xlu0 %1246 }
 0x9ac   :  { %v1269_v43 = vmul.f32 %v1247_v22, %v4113_v21  ;;  %1290 = vrot.lane.b32.xlu1 %v1271_v10, %s3541_s25  ;;  %v1233_v22 = vmul.f32 %v1217_v38, %v4129_v48 }
 0x9ad   :  { %v1245_v54 = vpop.permute.xlu1 %1244 }
 0x9ae   :  { %v1268_v31 = vmul.f32 %v1245_v54, %v4117_v28  ;;  %1286 = vrot.lane.b32.xlu0 %v1269_v43, %s3541_s25  ;;  %v1234_v54 = vmul.f32 %v1218_v56, %v4133_v32 }
 0x9af   :  { %v1253_v52 = vpop.permute.xlu0 %1252 }
 0x9b0   :  { %v1272_v37 = vmul.f32 %v1253_v52, %v4121_v33  ;;  %1284 = vrot.lane.b32.xlu1 %v1268_v31, %s3541_s25 }
 0x9b1   :  { %v1249_v51 = vpop.permute.xlu1 %1248 }
 0x9b2   :  { %v1270_v60 = vmul.f32 %v1249_v51, %v4125_v55  ;;  %1292 = vrot.lane.b32.xlu0 %v1272_v37, %s3541_s25 }
 0x9b3   :  { %v1255_v49 = vpop.permute.xlu0 %1254 }
 0x9b4   :  { %v1273_v15 = vmul.f32 %v1255_v49, %v4129_v48  ;;  %1288 = vrot.lane.b32.xlu1 %v1270_v60, %s3541_s25 }
 0x9b5   :  { %v1257_v17 = vpop.permute.xlu1 %1256 }
 0x9b6   :  { %v1274_v53 = vmul.f32 %v1257_v17, %v4133_v32  ;;  %1294 = vrot.lane.b32.xlu0 %v1273_v15, %s3541_s25 }
 0x9b7   :  { %v1259_v16 = vpop.permute.xlu0 %1258 }
 0x9b8   :  { %v1275_v5 = vmul.f32 %v1259_v16, %v4137_v11  ;;  %1296 = vrot.lane.b32.xlu1 %v1274_v53, %s3541_s25 }
 0x9ba   :  { %1298 = vrot.lane.b32.xlu0 %v1275_v5, %s3541_s25 }
 0xa1e   :  { %v1291_v59 = vpop.permute.xlu1 %1290 }
 0xa1f   :  { %v4146_v63 = vadd.f32 %v1291_v59, %v1231_v7 }
 0xa20   :  { %v1287_v3 = vpop.permute.xlu0 %1286 }
 0xa21   :  { %3350 = vtanh.f32 %v4146_v63  ;;  %v4151_v8 = vadd.f32 %v1287_v3, %v1229_v12 }
 0xa22   :  { %v1285_v13 = vpop.permute.xlu1 %1284 }
 0xa23   :  { %3352 = vtanh.f32 %v4151_v8  ;;  %v4156_v18 = vadd.f32 %v1285_v13, %v1228_v30 }
 0xa24   :  { %v1293_v19 = vpop.permute.xlu0 %1292 }
 0xa25   :  { %3354 = vtanh.f32 %v4156_v18  ;;  %v4161_v45 = vadd.f32 %v1293_v19, %v1232_v20 }
 0xa26   :  { %v1289_v10 = vpop.permute.xlu1 %1288 }
 0xa27   :  { %3356 = vtanh.f32 %v4161_v45  ;;  %v4166_v14 = vadd.f32 %v1289_v10, %v1230_v39 }
 0xa28   :  { %v1295_v43 = vpop.permute.xlu0 %1294 }
 0xa29   :  { %3358 = vtanh.f32 %v4166_v14  ;;  %v4171_v47 = vadd.f32 %v1295_v43, %v1233_v22 }
 0xa2a   :  { %v1297_v31 = vpop.permute.xlu1 %1296 }
 0xa2b   :  { %3360 = vtanh.f32 %v4171_v47  ;;  %v4175_v1 = vadd.f32 %v1297_v31, %v1234_v54 }
 0xa2c   :  { %v1299_v52 = vpop.permute.xlu0 %1298 }
 0xa2d   :  { %3362 = vtanh.f32 %v4175_v1  ;;  %v4179_v37 = vadd.f32 %v1299_v52, %v1235_v25 }
 0xa2e   :  { %v3351_v44 = vpop.eup %3350 }
 0xa2f   :  { %3364 = vtanh.f32 %v4179_v37  ;;  %1338 = vrot.lane.b32.xlu1 %v3351_v44, %s3540_s3 }
 0xa30   :  { %v3353_v40 = vpop.eup %3352 }
 0xa31   :  { %1334 = vrot.lane.b32.xlu0 %v3353_v40, %s3540_s3 }
 0xa32   :  { %v3355_v51 = vpop.eup %3354 }
 0xa33   :  { %1332 = vrot.lane.b32.xlu1 %v3355_v51, %s3540_s3 }
 0xa34   :  { %v3357_v60 = vpop.eup %3356 }
 0xa35   :  { %1340 = vrot.lane.b32.xlu0 %v3357_v60, %s3540_s3 }
 0xa36   :  { %v3359_v57 = vpop.eup %3358 }
 0xa37   :  { %1336 = vrot.lane.b32.xlu1 %v3359_v57, %s3540_s3 }
 0xa38   :  { %v3361_v49 = vpop.eup %3360 }
 0xa39   :  { %1342 = vrot.lane.b32.xlu0 %v3361_v49, %s3540_s3 }
 0xa3a   :  { %v3363_v15 = vpop.eup %3362 }
 0xa3b   :  { %1344 = vrot.lane.b32.xlu1 %v3363_v15, %s3540_s3 }
 0xa3c   :  { %v3365_v17 = vpop.eup %3364 }
 0xa3d   :  { %1346 = vrot.lane.b32.xlu0 %v3365_v17, %s3540_s3 }
 0xaa1   :  { %v1339_v53 = vpop.permute.xlu1 %1338 }
 0xaa2   :  { %v1359_v20 = vmul.f32 %v1339_v53, %v4110_v34 }
 0xaa3   :  { %v1335_v16 = vpop.permute.xlu0 %1334 }
 0xaa4   :  { %v1357_v58 = vmul.f32 %v1335_v16, %v4113_v21 }
 0xaa5   :  { %v1333_v5 = vpop.permute.xlu1 %1332 }
 0xaa6   :  { %v1356_v62 = vmul.f32 %v1333_v5, %v4117_v28  ;;  %v1373_v6 = vrot.slane %v1357_v58, 2 }
 0xaa7   :  { %v1341_v7 = vpop.permute.xlu0 %1340 }
 0xaa8   :  { %v1372_v59 = vrot.slane %v1356_v62, 3  ;;  %v1360_v12 = vmul.f32 %v1341_v7, %v4121_v33 }
 0xaa9   :  { %v1337_v9 = vpop.permute.xlu1 %1336 }
 0xaaa   :  { %v1358_v3 = vmul.f32 %v1337_v9, %v4125_v55  ;;  %v1374_v19 = vsel %vm454_vm2, %v1373_v6, %v1372_v59  ;;  %v1378_v28 = vrot.slane %v1360_v12, 7 }
 0xaab   :  { %v1343_v30 = vpop.permute.xlu0 %1342 }
 0xaac   :  { %v1375_v13 = vrot.slane %v1358_v3, 1  ;;  %v1361_v24 = vmul.f32 %v1343_v30, %v4129_v48 }
 0xaad   :  { %v1345_v38 = vpop.permute.xlu1 %1344 }
 0xaae   :  { %v1376_v21 = vsel %vm457_vm3, %v1375_v13, %v1374_v19  ;;  %v1380_v39 = vrot.slane %v1361_v24, 6  ;;  %v1362_v10 = vmul.f32 %v1345_v38, %v4133_v32 }
 0xaaf   :  { %v1377_v33 = vsel %vm460_vm4, %v1359_v20, %v1376_v21  ;;  %v1347_v56 = vpop.permute.xlu0 %1346 }
 0xab0   :  { %v1379_v55 = vsel %vm463_vm5, %v1378_v28, %v1377_v33  ;;  %v1382_v22 = vrot.slane %v1362_v10, 5  ;;  %v1363_v43 = vmul.f32 %v1347_v56, %v4137_v11 }
 0xab1   :  { %v1381_v48 = vsel %vm466_vm6, %v1380_v39, %v1379_v55 }
 0xab2   :  { %v1384_v34 = vrot.slane %v1363_v43, 4  ;;  %v1383_v27 = vsel %vm469_vm7, %v1382_v22, %v1381_v48 }
 0xab4   :  { %v1385_v54 = vsel %vm472_vm8, %v1384_v34, %v1383_v27 }
 0xab5   :  { %1386 = vrot.lane.b32.xlu1 %v1385_v54, %s3541_s25 }
 0xb27   :  { %v1387_v31 = vpop.permute.xlu1 %1386 }
 0xb28   :  { %3142 = vmatmul.mubr.msk.f32.vlgmr.msra.gmra.mxu0 %vm54_vm0, %v1387_v31 }
 0xb29   :  { %3156 = vmatpush3.msra.mxu0 %v4067_v23  ;;  %3163 = vmatprep.mubr.msk.f32.mxu0 %vm3539_vm1, %v3538_v2 }
 0xb2a   :  { %3157 = vmatprep.subr.mxu0 %v3538_v2 }
 0xb2b   :  { %3158 = vmatpush3.msra.mxu0 %v4076_v4 }
 0xb2c   :  { %3159 = vmatprep.subr.mxu0 %v3538_v2 }
 0xb2d   :  { %3160 = vmatpush3.msra.mxu0 %v4083_v61 }
 0xb2e   :  { %3161 = vmatprep.subr.mxu0 %v3538_v2 }
 0xb2f   :  { %3162 = vmatpush3.msra.mxu0 %v4090_v0 }
 0xb30   :  { %3177 = vmatprep.subr.mxu0 %v3538_v2 }
 0xbe8   :  { %v1456_v32 = vpop.f32.mrf.mxu0 }
 0xbe9   :  { %v1461_v11 = vrot.slane %v1456_v32, 4  ;;  %v1462_v25 = vrot.slane %v1456_v32, 5  ;;  %v1463_v52 = vrot.slane %v1456_v32, 6  ;;  %v1480_v44 = vadd.f32 %v1456_v32, %v3715_v46 }
 0xbea   :  { %v3143_v40 = vpop.f32.mrf.mxu0  ;;  %v1464_v60 = vrot.slane %v1456_v32, 7  ;;  %v1465_v49 = vrot.slane %v1456_v32, 1  ;;  %v1467_v17 = vrot.slane %v1456_v32, 3  ;;  %v1466_v16 = vrot.slane %v1456_v32, 2 }
 0xbeb   :  { %v1476_v51 = vadd.f32 %v1461_v11, %v3697_v26  ;;  %v1477_v57 = vadd.f32 %v1462_v25, %v3703_v35  ;;  %3366 = vtanh.f32 %v1480_v44  ;;  %v1478_v15 = vadd.f32 %v1463_v52, %v3709_v41 }
 0xbec   :  { %v1479_v53 = vadd.f32 %v1464_v60, %v3699_v29  ;;  %v1481_v5 = vadd.f32 %v1465_v49, %v3705_v36  ;;  %v1483_v62 = vadd.f32 %v1467_v17, %v3711_v42  ;;  %v1482_v58 = vadd.f32 %v1466_v16, %v3718_v50 }
 0xbed   :  { %3368 = vtanh.f32 %v1476_v51 }
 0xbee   :  { %3370 = vtanh.f32 %v1477_v57 }
 0xbef   :  { %3372 = vtanh.f32 %v1478_v15 }
 0xbf0   :  { %3374 = vtanh.f32 %v1479_v53 }
 0xbf1   :  { %3376 = vtanh.f32 %v1481_v5  ;;  %v1520_v5 = vrot.slane %v4161_v45, 7 }
 0xbf2   :  { %3378 = vtanh.f32 %v1483_v62  ;;  %v1516_v62 = vrot.slane %v4156_v18, 7 }
 0xbf3   :  { %3380 = vtanh.f32 %v1482_v58 }
 0xbf8   :  { %v3367_v7 = vpop.eup %3366 }
 0xbf9   :  { %1556 = vrot.lane.b32.xlu1 %v3367_v7, %s3540_s3  ;;  %v1496_v24 = vmul.f32 0.5, %v3367_v7 }
 0xbfa   :  { %v3369_v59 = vpop.eup %3368 }
 0xbfb   :  { %1548 = vrot.lane.b32.xlu0 %v3369_v59, %s3540_s3  ;;  %v3371_v9 = vpop.eup %3370  ;;  %v1492_v20 = vmul.f32 0.5, %v3369_v59  ;;  %v4233_v19 = vadd.f32 0.5, %v1496_v24  ;;  %v1519_v24 = vrot.slane %v4146_v63, 7 }
 0xbfc   :  { %v3373_v12 = vpop.eup %3372  ;;  %v1493_v38 = vmul.f32 0.5, %v3371_v9 }
 0xbfd   :  { %1550 = vrot.lane.b32.xlu1 %v3371_v9, %s3540_s3  ;;  %v3375_v3 = vpop.eup %3374  ;;  %v4235_v21 = vadd.f32 0.5, %v1492_v20  ;;  %v1494_v39 = vmul.f32 0.5, %v3373_v12  ;;  %v1536_v58 = vmul.f32 %v1520_v5, %v4233_v19  ;;  %v1517_v9 = vrot.slane %v4151_v8, 7 }
 0xbfe   :  { %v3377_v6 = vpop.eup %3376  ;;  %v4240_v55 = vadd.f32 0.5, %v1493_v38  ;;  %v1495_v22 = vmul.f32 0.5, %v3375_v3  ;;  %v1521_v38 = vrot.slane %v4171_v47, 7 }
 0xbff   :  { %1552 = vrot.lane.b32.xlu0 %v3373_v12, %s3540_s3  ;;  %v3379_v30 = vpop.eup %3378  ;;  %v4243_v48 = vadd.f32 0.5, %v1494_v39  ;;  %v1497_v34 = vmul.f32 0.5, %v3377_v6  ;;  %v1532_v59 = vmul.f32 %v1516_v62, %v4235_v21 }
 0xc00   :  { %v3381_v13 = vpop.eup %3380  ;;  %v4248_v32 = vadd.f32 0.5, %v1495_v22  ;;  %v1499_v11 = vmul.f32 0.5, %v3379_v30  ;;  %v1533_v45 = vmul.f32 %v1517_v9, %v4240_v55  ;;  %v1522_v22 = vrot.slane %v4175_v1, 7 }
 0xc01   :  { %1554 = vrot.lane.b32.xlu1 %v3375_v3, %s3540_s3  ;;  %v4251_v52 = vadd.f32 0.5, %v1497_v34  ;;  %v1498_v44 = vmul.f32 0.5, %v3381_v13 }
 0xc02   :  { %v4256_v57 = vadd.f32 0.5, %v1499_v11 }
 0xc03   :  { %1558 = vrot.lane.b32.xlu0 %v3377_v6, %s3540_s3  ;;  %v4259_v15 = vadd.f32 0.5, %v1498_v44  ;;  %v1518_v6 = vrot.slane %v4166_v14, 7  ;;  %v1535_v14 = vmul.f32 %v1519_v24, %v4248_v32 }
 0xc05   :  { %1562 = vrot.lane.b32.xlu1 %v3379_v30, %s3540_s3 }
 0xc07   :  { %1560 = vrot.lane.b32.xlu0 %v3381_v13, %s3540_s3  ;;  %v1534_v13 = vmul.f32 %v1518_v6, %v4243_v48 }
 0xc6b   :  { %v1557_v28 = vpop.permute.xlu1 %1556 }
 0xc6c   :  { %v1576_v10 = vmul.f32 %v1557_v28, %v4233_v19 }
 0xc6d   :  { %v1549_v33 = vpop.permute.xlu0 %1548 }
 0xc6e   :  { %v1572_v56 = vmul.f32 %v1549_v33, %v4235_v21  ;;  %1596 = vrot.lane.b32.xlu1 %v1576_v10, %s3541_s25  ;;  %v1537_v10 = vmul.f32 %v1521_v38, %v4251_v52  ;;  %v1523_v33 = vrot.slane %v4179_v37, 7 }
 0xc6f   :  { %v1551_v43 = vpop.permute.xlu1 %1550 }
 0xc70   :  { %1588 = vrot.lane.b32.xlu0 %v1572_v56, %s3541_s25  ;;  %v1573_v27 = vmul.f32 %v1551_v43, %v4240_v55  ;;  %v1539_v47 = vmul.f32 %v1523_v33, %v4256_v57 }
 0xc71   :  { %v1553_v54 = vpop.permute.xlu0 %1552 }
 0xc72   :  { %v1574_v31 = vmul.f32 %v1553_v54, %v4243_v48  ;;  %1590 = vrot.lane.b32.xlu1 %v1573_v27, %s3541_s25  ;;  %v1538_v27 = vmul.f32 %v1522_v22, %v4259_v15 }
 0xc73   :  { %v1555_v25 = vpop.permute.xlu1 %1554 }
 0xc74   :  { %1592 = vrot.lane.b32.xlu0 %v1574_v31, %s3541_s25  ;;  %v1575_v40 = vmul.f32 %v1555_v25, %v4248_v32 }
 0xc75   :  { %v1559_v51 = vpop.permute.xlu0 %1558 }
 0xc76   :  { %v1577_v60 = vmul.f32 %v1559_v51, %v4251_v52  ;;  %1594 = vrot.lane.b32.xlu1 %v1575_v40, %s3541_s25 }
 0xc77   :  { %v1563_v49 = vpop.permute.xlu1 %1562 }
 0xc78   :  { %1598 = vrot.lane.b32.xlu0 %v1577_v60, %s3541_s25  ;;  %v1579_v17 = vmul.f32 %v1563_v49, %v4256_v57 }
 0xc79   :  { %v1561_v53 = vpop.permute.xlu0 %1560 }
 0xc7a   :  { %v1578_v16 = vmul.f32 %v1561_v53, %v4259_v15  ;;  %1602 = vrot.lane.b32.xlu1 %v1579_v17, %s3541_s25 }
 0xc7c   :  { %1600 = vrot.lane.b32.xlu0 %v1578_v16, %s3541_s25 }
 0xce0   :  { %v1597_v7 = vpop.permute.xlu1 %1596 }
 0xce1   :  { %v4270_v12 = vadd.f32 %v1597_v7, %v1536_v58 }
 0xce2   :  { %v1589_v3 = vpop.permute.xlu0 %1588 }
 0xce3   :  { %v4273_v30 = vadd.f32 %v1589_v3, %v1532_v59  ;;  %3382 = vtanh.f32 %v4270_v12 }
 0xce4   :  { %v1591_v18 = vpop.permute.xlu1 %1590 }
 0xce5   :  { %3384 = vtanh.f32 %v4273_v30  ;;  %v4280_v20 = vadd.f32 %v1591_v18, %v1533_v45 }
 0xce6   :  { %v1593_v8 = vpop.permute.xlu0 %1592 }
 0xce7   :  { %v4283_v28 = vadd.f32 %v1593_v8, %v1534_v13  ;;  %3386 = vtanh.f32 %v4280_v20 }
 0xce8   :  { %v1595_v39 = vpop.permute.xlu1 %1594 }
 0xce9   :  { %3388 = vtanh.f32 %v4283_v28  ;;  %v4290_v56 = vadd.f32 %v1595_v39, %v1535_v14 }
 0xcea   :  { %v1599_v63 = vpop.permute.xlu0 %1598 }
 0xceb   :  { %v4293_v43 = vadd.f32 %v1599_v63, %v1537_v10  ;;  %3390 = vtanh.f32 %v4290_v56 }
 0xcec   :  { %v1603_v34 = vpop.permute.xlu1 %1602 }
 0xced   :  { %3392 = vtanh.f32 %v4293_v43  ;;  %v4299_v54 = vadd.f32 %v1603_v34, %v1539_v47 }
 0xcee   :  { %v1601_v31 = vpop.permute.xlu0 %1600 }
 0xcef   :  { %v4301_v37 = vadd.f32 %v1601_v31, %v1538_v27  ;;  %3394 = vtanh.f32 %v4299_v54 }
 0xcf0   :  { %v3383_v11 = vpop.eup %3382 }
 0xcf1   :  { %3396 = vtanh.f32 %v4301_v37  ;;  %1644 = vrot.lane.b32.xlu1 %v3383_v11, %s3540_s3 }
 0xcf2   :  { %v3385_v1 = vpop.eup %3384 }
 0xcf3   :  { %1636 = vrot.lane.b32.xlu0 %v3385_v1, %s3540_s3 }
 0xcf4   :  { %v3387_v25 = vpop.eup %3386 }
 0xcf5   :  { %1638 = vrot.lane.b32.xlu1 %v3387_v25, %s3540_s3 }
 0xcf6   :  { %v3389_v44 = vpop.eup %3388 }
 0xcf7   :  { %1640 = vrot.lane.b32.xlu0 %v3389_v44, %s3540_s3 }
 0xcf8   :  { %v3391_v40 = vpop.eup %3390 }
 0xcf9   :  { %1642 = vrot.lane.b32.xlu1 %v3391_v40, %s3540_s3 }
 0xcfa   :  { %v3393_v51 = vpop.eup %3392 }
 0xcfb   :  { %1646 = vrot.lane.b32.xlu0 %v3393_v51, %s3540_s3 }
 0xcfc   :  { %v3395_v60 = vpop.eup %3394 }
 0xcfd   :  { %1650 = vrot.lane.b32.xlu1 %v3395_v60, %s3540_s3 }
 0xcfe   :  { %v3397_v49 = vpop.eup %3396 }
 0xcff   :  { %1648 = vrot.lane.b32.xlu0 %v3397_v49, %s3540_s3 }
 0xd63   :  { %v1645_v17 = vpop.permute.xlu1 %1644 }
 0xd64   :  { %v1664_v38 = vmul.f32 %v1645_v17, %v4233_v19 }
 0xd65   :  { %v1637_v53 = vpop.permute.xlu0 %1636 }
 0xd66   :  { %v1660_v16 = vmul.f32 %v1637_v53, %v4235_v21 }
 0xd67   :  { %v1639_v5 = vpop.permute.xlu1 %1638 }
 0xd68   :  { %v1661_v62 = vmul.f32 %v1639_v5, %v4240_v55  ;;  %v1676_v59 = vrot.slane %v1660_v16, 4 }
 0xd69   :  { %v1641_v58 = vpop.permute.xlu0 %1640 }
 0xd6a   :  { %v1662_v7 = vmul.f32 %v1641_v58, %v4243_v48  ;;  %v1677_v9 = vrot.slane %v1661_v62, 3 }
 0xd6b   :  { %v1643_v6 = vpop.permute.xlu1 %1642 }
 0xd6c   :  { %v1679_v3 = vrot.slane %v1662_v7, 2  ;;  %v1678_v45 = vsel %vm454_vm2, %v1677_v9, %v1676_v59  ;;  %v1663_v18 = vmul.f32 %v1643_v6, %v4248_v32 }
 0xd6d   :  { %v1647_v13 = vpop.permute.xlu0 %1646 }
 0xd6e   :  { %v1680_v24 = vsel %vm457_vm3, %v1679_v3, %v1678_v45  ;;  %v1665_v8 = vmul.f32 %v1647_v13, %v4251_v52  ;;  %v1681_v21 = vrot.slane %v1663_v18, 1 }
 0xd6f   :  { %v1651_v55 = vpop.permute.xlu1 %1650 }
 0xd70   :  { %v1682_v14 = vsel %vm460_vm4, %v1681_v21, %v1680_v24  ;;  %v1684_v48 = vrot.slane %v1665_v8, 7  ;;  %v1667_v39 = vmul.f32 %v1651_v55, %v4256_v57 }
 0xd71   :  { %v1649_v10 = vpop.permute.xlu0 %1648  ;;  %v1683_v33 = vsel %vm463_vm5, %v1664_v38, %v1682_v14 }
 0xd72   :  { %v1666_v63 = vmul.f32 %v1649_v10, %v4259_v15  ;;  %v1685_v22 = vsel %vm466_vm6, %v1684_v48, %v1683_v33  ;;  %v1688_v47 = vrot.slane %v1667_v39, 5 }
 0xd74   :  { %v1686_v32 = vrot.slane %v1666_v63, 6 }
 0xd76   :  { %v1687_v52 = vsel %vm469_vm7, %v1686_v32, %v1685_v22 }
 0xd77   :  { %v1689_v34 = vsel %vm472_vm8, %v1688_v47, %v1687_v52 }
 0xd78   :  { %1690 = vrot.lane.b32.xlu0 %v1689_v34, %s3541_s25 }
 0xdea   :  { %v1691_v19 = vpop.permute.xlu0 %1690 }
 0xdeb   :  { %3153 = vmatmul.mubr.msk.f32.vlgmr.msra.gmra.mxu1 %vm54_vm0, %v1691_v19 }
 0xdec   :  { %3167 = vmatpush3.msra.mxu1 %v4067_v23  ;;  %3174 = vmatprep.mubr.msk.f32.mxu1 %vm3539_vm1, %v3538_v2 }
 0xded   :  { %3168 = vmatprep.subr.mxu1 %v3538_v2 }
 0xdee   :  { %3169 = vmatpush3.msra.mxu1 %v4076_v4 }
 0xdef   :  { %3170 = vmatprep.subr.mxu1 %v3538_v2 }
 0xdf0   :  { %3171 = vmatpush3.msra.mxu1 %v4083_v61 }
 0xdf1   :  { %3172 = vmatprep.subr.mxu1 %v3538_v2 }
 0xdf2   :  { %3173 = vmatpush3.msra.mxu1 %v4090_v0 }
 0xdf3   :  { %3188 = vmatprep.subr.mxu1 %v3538_v2 }
 0xeab   :  { %v1760_v57 = vpop.f32.mrf.mxu1 }
 0xeac   :  { %v1765_v15 = vrot.slane %v1760_v57, 3  ;;  %v1766_v23 = vrot.slane %v1760_v57, 4  ;;  %v1767_v27 = vrot.slane %v1760_v57, 5  ;;  %v1768_v31 = vrot.slane %v1760_v57, 6 }
 0xead   :  { %v3154_v11 = vpop.f32.mrf.mxu1  ;;  %v1769_v25 = vrot.slane %v1760_v57, 7  ;;  %v1770_v61 = vrot.slane %v1760_v57, 1  ;;  %v1771_v51 = vrot.slane %v1760_v57, 2  ;;  %v1785_v49 = vadd.f32 %v1760_v57, %v3705_v36 }
 0xeae   :  { %v1780_v1 = vadd.f32 %v1765_v15, %v3697_v26  ;;  %v1781_v4 = vadd.f32 %v1766_v23, %v3703_v35  ;;  %v1782_v44 = vadd.f32 %v1767_v27, %v3709_v41  ;;  %v1783_v40 = vadd.f32 %v1768_v31, %v3699_v29 }
 0xeaf   :  { %v1784_v0 = vadd.f32 %v1769_v25, %v3715_v46  ;;  %v1786_v60 = vadd.f32 %v1770_v61, %v3718_v50  ;;  %v1787_v17 = vadd.f32 %v1771_v51, %v3711_v42  ;;  %v1820_v61 = vrot.slane %v4273_v30, 7 }
 0xeb0   :  { %3398 = vtanh.f32 %v1780_v1 }
 0xeb1   :  { %3400 = vtanh.f32 %v1781_v4 }
 0xeb2   :  { %3402 = vtanh.f32 %v1782_v44 }
 0xeb3   :  { %3404 = vtanh.f32 %v1783_v40  ;;  %v1821_v40 = vrot.slane %v4280_v20, 7 }
 0xeb4   :  { %3406 = vtanh.f32 %v1784_v0 }
 0xeb5   :  { %3408 = vtanh.f32 %v1786_v60 }
 0xeb6   :  { %3410 = vtanh.f32 %v1785_v49  ;;  %v1822_v49 = vrot.slane %v4283_v28, 7 }
 0xeb7   :  { %3412 = vtanh.f32 %v1787_v17 }
 0xebd   :  { %v3399_v53 = vpop.eup %3398 }
 0xebe   :  { %v3401_v16 = vpop.eup %3400  ;;  %1852 = vrot.lane.b32.xlu1 %v3399_v53, %s3540_s3  ;;  %v1796_v3 = vmul.f32 0.5, %v3399_v53 }
 0xebf   :  { %1854 = vrot.lane.b32.xlu0 %v3401_v16, %s3540_s3  ;;  %v3403_v5 = vpop.eup %3402  ;;  %v1797_v6 = vmul.f32 0.5, %v3401_v16  ;;  %v1823_v16 = vrot.slane %v4290_v56, 7 }
 0xec0   :  { %v3405_v62 = vpop.eup %3404  ;;  %v4356_v45 = vadd.f32 0.5, %v1796_v3  ;;  %v1798_v18 = vmul.f32 0.5, %v3403_v5 }
 0xec1   :  { %v3407_v58 = vpop.eup %3406  ;;  %v4358_v13 = vadd.f32 0.5, %v1797_v6  ;;  %v1799_v8 = vmul.f32 0.5, %v3405_v62 }
 0xec2   :  { %1856 = vrot.lane.b32.xlu1 %v3403_v5, %s3540_s3  ;;  %v3409_v7 = vpop.eup %3408  ;;  %v4363_v14 = vadd.f32 0.5, %v1798_v18  ;;  %v1800_v48 = vmul.f32 0.5, %v3407_v58  ;;  %v1836_v0 = vmul.f32 %v1820_v61, %v4356_v45  ;;  %v1825_v18 = vrot.slane %v4293_v43, 7 }
 0xec3   :  { %1858 = vrot.lane.b32.xlu0 %v3405_v62, %s3540_s3  ;;  %v3411_v59 = vpop.eup %3410  ;;  %v4366_v39 = vadd.f32 0.5, %v1799_v8  ;;  %v1802_v33 = vmul.f32 0.5, %v3409_v7  ;;  %v1837_v51 = vmul.f32 %v1821_v40, %v4358_v13  ;;  %v1827_v8 = vrot.slane %v4299_v54, 7 }
 0xec4   :  { %v3413_v9 = vpop.eup %3412  ;;  %v4371_v47 = vadd.f32 0.5, %v1800_v48  ;;  %v1801_v52 = vmul.f32 0.5, %v3411_v59  ;;  %v1838_v30 = vmul.f32 %v1822_v49, %v4363_v14 }
 0xec5   :  { %v4374_v34 = vadd.f32 0.5, %v1802_v33  ;;  %v1803_v57 = vmul.f32 0.5, %v3413_v9  ;;  %v1839_v20 = vmul.f32 %v1823_v16, %v4366_v39 }
 0xec6   :  { %1860 = vrot.lane.b32.xlu1 %v3407_v58, %s3540_s3  ;;  %v4379_v31 = vadd.f32 0.5, %v1801_v52  ;;  %v1824_v58 = vrot.slane %v4270_v12, 7 }
 0xec7   :  { %1864 = vrot.lane.b32.xlu0 %v3409_v7, %s3540_s3  ;;  %v4382_v11 = vadd.f32 0.5, %v1803_v57 }
 0xec8   :  { %v1840_v56 = vmul.f32 %v1824_v58, %v4371_v47 }
 0xeca   :  { %1862 = vrot.lane.b32.xlu1 %v3411_v59, %s3540_s3  ;;  %v1826_v59 = vrot.slane %v4301_v37, 7  ;;  %v1841_v37 = vmul.f32 %v1825_v18, %v4379_v31 }
 0xecb   :  { %1866 = vrot.lane.b32.xlu0 %v3413_v9, %s3540_s3 }
 0xecc   :  { %v1842_v3 = vmul.f32 %v1826_v59, %v4374_v34 }
 0xf30   :  { %v1853_v24 = vpop.permute.xlu1 %1852 }
 0xf31   :  { %v1855_v21 = vpop.permute.xlu0 %1854  ;;  %v1876_v38 = vmul.f32 %v1853_v24, %v4356_v45 }
 0xf32   :  { %v1877_v55 = vmul.f32 %v1855_v21, %v4358_v13 }
 0xf33   :  { %1892 = vrot.lane.b32.xlu1 %v1876_v38, %s3541_s25  ;;  %v1843_v38 = vmul.f32 %v1827_v8, %v4382_v11 }
 0xf34   :  { %1894 = vrot.lane.b32.xlu0 %v1877_v55, %s3541_s25  ;;  %v1857_v10 = vpop.permute.xlu1 %1856 }
 0xf35   :  { %v1859_v63 = vpop.permute.xlu0 %1858  ;;  %v1878_v32 = vmul.f32 %v1857_v10, %v4363_v14 }
 0xf36   :  { %v1879_v22 = vmul.f32 %v1859_v63, %v4366_v39 }
 0xf37   :  { %1896 = vrot.lane.b32.xlu1 %v1878_v32, %s3541_s25 }
 0xf38   :  { %1898 = vrot.lane.b32.xlu0 %v1879_v22, %s3541_s25  ;;  %v1861_v19 = vpop.permute.xlu1 %1860 }
 0xf39   :  { %v1865_v15 = vpop.permute.xlu0 %1864  ;;  %v1880_v23 = vmul.f32 %v1861_v19, %v4371_v47 }
 0xf3a   :  { %v1882_v27 = vmul.f32 %v1865_v15, %v4374_v34 }
 0xf3b   :  { %1900 = vrot.lane.b32.xlu1 %v1880_v23, %s3541_s25 }
 0xf3c   :  { %1904 = vrot.lane.b32.xlu0 %v1882_v27, %s3541_s25  ;;  %v1863_v1 = vpop.permute.xlu1 %1862 }
 0xf3d   :  { %v1867_v4 = vpop.permute.xlu0 %1866  ;;  %v1881_v25 = vmul.f32 %v1863_v1, %v4379_v31 }
 0xf3e   :  { %v1883_v44 = vmul.f32 %v1867_v4, %v4382_v11 }
 0xf3f   :  { %1902 = vrot.lane.b32.xlu1 %v1881_v25, %s3541_s25 }
 0xf40   :  { %1906 = vrot.lane.b32.xlu0 %v1883_v44, %s3541_s25 }
 0xfa5   :  { %v1893_v60 = vpop.permute.xlu1 %1892 }
 0xfa6   :  { %v1895_v17 = vpop.permute.xlu0 %1894  ;;  %v4393_v53 = vadd.f32 %v1893_v60, %v1836_v0 }
 0xfa7   :  { %v4396_v5 = vadd.f32 %v1895_v17, %v1837_v51 }
 0xfa8   :  { %3414 = vtanh.f32 %v4393_v53 }
 0xfa9   :  { %3416 = vtanh.f32 %v4396_v5  ;;  %v1897_v62 = vpop.permute.xlu1 %1896 }
 0xfaa   :  { %v1899_v7 = vpop.permute.xlu0 %1898  ;;  %v4403_v28 = vadd.f32 %v1897_v62, %v1838_v30 }
 0xfab   :  { %v4406_v9 = vadd.f32 %v1899_v7, %v1839_v20 }
 0xfac   :  { %3418 = vtanh.f32 %v4403_v28 }
 0xfad   :  { %3420 = vtanh.f32 %v4406_v9  ;;  %v1901_v6 = vpop.permute.xlu1 %1900 }
 0xfae   :  { %v1905_v24 = vpop.permute.xlu0 %1904  ;;  %v4413_v12 = vadd.f32 %v1901_v6, %v1840_v56 }
 0xfaf   :  { %v4416_v21 = vadd.f32 %v1905_v24, %v1842_v3 }
 0xfb0   :  { %3422 = vtanh.f32 %v4413_v12 }
 0xfb1   :  { %3424 = vtanh.f32 %v4416_v21  ;;  %v1903_v55 = vpop.permute.xlu1 %1902 }
 0xfb2   :  { %v1907_v48 = vpop.permute.xlu0 %1906  ;;  %v4422_v10 = vadd.f32 %v1903_v55, %v1841_v37 }
 0xfb3   :  { %v4424_v43 = vadd.f32 %v1907_v48, %v1843_v38 }
 0xfb4   :  { %3426 = vtanh.f32 %v4422_v10 }
 0xfb5   :  { %v3415_v33 = vpop.eup %3414  ;;  %3428 = vtanh.f32 %v4424_v43 }
 0xfb6   :  { %v3417_v54 = vpop.eup %3416  ;;  %1940 = vrot.lane.b32.xlu1 %v3415_v33, %s3540_s3 }
 0xfb7   :  { %1942 = vrot.lane.b32.xlu0 %v3417_v54, %s3540_s3 }
 0xfb9   :  { %v3419_v63 = vpop.eup %3418 }
 0xfba   :  { %v3421_v32 = vpop.eup %3420  ;;  %1944 = vrot.lane.b32.xlu1 %v3419_v63, %s3540_s3 }
 0xfbb   :  { %1946 = vrot.lane.b32.xlu0 %v3421_v32, %s3540_s3 }
 0xfbd   :  { %v3423_v22 = vpop.eup %3422 }
 0xfbe   :  { %v3425_v52 = vpop.eup %3424  ;;  %1948 = vrot.lane.b32.xlu1 %v3423_v22, %s3540_s3 }
 0xfbf   :  { %1952 = vrot.lane.b32.xlu0 %v3425_v52, %s3540_s3 }
 0xfc1   :  { %v3427_v19 = vpop.eup %3426 }
 0xfc2   :  { %v3429_v57 = vpop.eup %3428  ;;  %1950 = vrot.lane.b32.xlu1 %v3427_v19, %s3540_s3 }
 0xfc3   :  { %1954 = vrot.lane.b32.xlu0 %v3429_v57, %s3540_s3 }
0x1028   :  { %v1941_v15 = vpop.permute.xlu1 %1940 }
0x1029   :  { %v1943_v23 = vpop.permute.xlu0 %1942  ;;  %v1964_v27 = vmul.f32 %v1941_v15, %v4356_v45 }
0x102a   :  { %v1965_v1 = vmul.f32 %v1943_v23, %v4358_v13 }
0x102b   :  { %v1980_v25 = vrot.slane %v1964_v27, 5 }
0x102c   :  { %v1981_v4 = vrot.slane %v1965_v1, 4  ;;  %v1945_v44 = vpop.permute.xlu1 %1944 }
0x102d   :  { %v1947_v61 = vpop.permute.xlu0 %1946  ;;  %v1966_v40 = vmul.f32 %v1945_v44, %v4363_v14 }
0x102e   :  { %v1967_v0 = vmul.f32 %v1947_v61, %v4366_v39  ;;  %v1982_v60 = vsel %vm454_vm2, %v1981_v4, %v1980_v25 }
0x102f   :  { %v1983_v51 = vrot.slane %v1966_v40, 3 }
0x1030   :  { %v1985_v49 = vrot.slane %v1967_v0, 2  ;;  %v1949_v17 = vpop.permute.xlu1 %1948 }
0x1031   :  { %v1984_v16 = vsel %vm457_vm3, %v1983_v51, %v1982_v60  ;;  %v1953_v30 = vpop.permute.xlu0 %1952  ;;  %v1968_v45 = vmul.f32 %v1949_v17, %v4371_v47 }
0x1032   :  { %v1970_v13 = vmul.f32 %v1953_v30, %v4374_v34  ;;  %v1986_v62 = vsel %vm460_vm4, %v1985_v49, %v1984_v16 }
0x1033   :  { %v1987_v20 = vrot.slane %v1968_v45, 1 }
0x1034   :  { %v1951_v58 = vpop.permute.xlu1 %1950  ;;  %v1990_v59 = vrot.slane %v1970_v13, 7 }
0x1035   :  { %v1988_v14 = vsel %vm463_vm5, %v1987_v20, %v1986_v62  ;;  %v1955_v7 = vpop.permute.xlu0 %1954  ;;  %v1969_v39 = vmul.f32 %v1951_v58, %v4379_v31 }
0x1036   :  { %v1971_v56 = vmul.f32 %v1955_v7, %v4382_v11 }
0x1037   :  { %v1989_v3 = vsel %vm466_vm6, %v1969_v39, %v1988_v14 }
0x1038   :  { %v1992_v6 = vrot.slane %v1971_v56, 6  ;;  %v1991_v18 = vsel %vm469_vm7, %v1990_v59, %v1989_v3 }
0x103a   :  { %v1993_v47 = vsel %vm472_vm8, %v1992_v6, %v1991_v18 }
0x103b   :  { %1994 = vrot.lane.b32.xlu1 %v1993_v47, %s3541_s25 }
0x10ad   :  { %v1995_v34 = vpop.permute.xlu1 %1994 }
0x10ae   :  { %3164 = vmatmul.mubr.msk.f32.vlgmr.msra.gmra.mxu0 %vm54_vm0, %v1995_v34 }
0x10af   :  { %3185 = vmatprep.mubr.msk.f32.mxu0 %vm3539_vm1, %v3538_v2 }
0x116e   :  { %v2064_v24 = vpop.f32.mrf.mxu0 }
0x116f   :  { %v2069_v31 = vrot.slane %v2064_v24, 2  ;;  %v2070_v8 = vrot.slane %v2064_v24, 3  ;;  %v2071_v37 = vrot.slane %v2064_v24, 4  ;;  %v2072_v11 = vrot.slane %v2064_v24, 5 }
0x1170   :  { %v3165_v38 = vpop.f32.mrf.mxu0  ;;  %v2073_v33 = vrot.slane %v2064_v24, 6  ;;  %v2074_v63 = vrot.slane %v2064_v24, 7  ;;  %v2075_v22 = vrot.slane %v2064_v24, 1  ;;  %v2090_v15 = vadd.f32 %v2064_v24, %v3718_v50 }
0x1171   :  { %v2084_v55 = vadd.f32 %v2069_v31, %v3697_v26  ;;  %v2085_v48 = vadd.f32 %v2070_v8, %v3703_v35  ;;  %v2086_v54 = vadd.f32 %v2071_v37, %v3709_v41  ;;  %v2087_v32 = vadd.f32 %v2072_v11, %v3699_v29 }
0x1172   :  { %v2088_v52 = vadd.f32 %v2073_v33, %v3715_v46  ;;  %v2089_v19 = vadd.f32 %v2074_v63, %v3705_v36  ;;  %v2091_v57 = vadd.f32 %v2075_v22, %v3711_v42  ;;  %v2124_v63 = vrot.slane %v4393_v53, 7 }
0x1173   :  { %3430 = vtanh.f32 %v2084_v55 }
0x1174   :  { %3432 = vtanh.f32 %v2085_v48 }
0x1175   :  { %3434 = vtanh.f32 %v2086_v54 }
0x1176   :  { %3436 = vtanh.f32 %v2087_v32  ;;  %v2125_v32 = vrot.slane %v4396_v5, 7 }
0x1177   :  { %3438 = vtanh.f32 %v2088_v52 }
0x1178   :  { %3440 = vtanh.f32 %v2089_v19 }
0x1179   :  { %3442 = vtanh.f32 %v2091_v57  ;;  %v2126_v57 = vrot.slane %v4403_v28, 7 }
0x117a   :  { %3444 = vtanh.f32 %v2090_v15 }
0x1180   :  { %v3431_v23 = vpop.eup %3430 }
0x1181   :  { %v3433_v27 = vpop.eup %3432  ;;  %2156 = vrot.lane.b32.xlu0 %v3431_v23, %s3540_s3  ;;  %v2100_v0 = vmul.f32 0.5, %v3431_v23 }
0x1182   :  { %2158 = vrot.lane.b32.xlu1 %v3433_v27, %s3540_s3  ;;  %v3435_v1 = vpop.eup %3434  ;;  %v2101_v51 = vmul.f32 0.5, %v3433_v27  ;;  %v2127_v27 = vrot.slane %v4406_v9, 7 }
0x1183   :  { %v3437_v4 = vpop.eup %3436  ;;  %v4471_v60 = vadd.f32 0.5, %v2100_v0  ;;  %v2102_v49 = vmul.f32 0.5, %v3435_v1 }
0x1184   :  { %v3439_v25 = vpop.eup %3438  ;;  %v4473_v17 = vadd.f32 0.5, %v2101_v51  ;;  %v2103_v30 = vmul.f32 0.5, %v3437_v4 }
0x1185   :  { %2160 = vrot.lane.b32.xlu0 %v3435_v1, %s3540_s3  ;;  %v3441_v44 = vpop.eup %3440  ;;  %v4478_v62 = vadd.f32 0.5, %v2102_v49  ;;  %v2104_v58 = vmul.f32 0.5, %v3439_v25  ;;  %v2140_v22 = vmul.f32 %v2124_v63, %v4471_v60  ;;  %v2131_v49 = vrot.slane %v4424_v43, 7 }
0x1186   :  { %2162 = vrot.lane.b32.xlu1 %v3437_v4, %s3540_s3  ;;  %v3443_v61 = vpop.eup %3442  ;;  %v4481_v14 = vadd.f32 0.5, %v2103_v30  ;;  %v2105_v39 = vmul.f32 0.5, %v3441_v44  ;;  %v2141_v52 = vmul.f32 %v2125_v32, %v4473_v17  ;;  %v2130_v30 = vrot.slane %v4416_v21, 7 }
0x1187   :  { %v3445_v40 = vpop.eup %3444  ;;  %v4486_v6 = vadd.f32 0.5, %v2104_v58  ;;  %v2107_v18 = vmul.f32 0.5, %v3443_v61  ;;  %v2142_v53 = vmul.f32 %v2126_v57, %v4478_v62 }
0x1188   :  { %v4489_v47 = vadd.f32 0.5, %v2105_v39  ;;  %v2106_v24 = vmul.f32 0.5, %v3445_v40  ;;  %v2143_v5 = vmul.f32 %v2127_v27, %v4481_v14 }
0x1189   :  { %2164 = vrot.lane.b32.xlu0 %v3439_v25, %s3540_s3  ;;  %v4494_v11 = vadd.f32 0.5, %v2107_v18  ;;  %v2128_v25 = vrot.slane %v4413_v12, 7 }
0x118a   :  { %2166 = vrot.lane.b32.xlu1 %v3441_v44, %s3540_s3  ;;  %v4497_v38 = vadd.f32 0.5, %v2106_v24 }
0x118b   :  { %v2144_v9 = vmul.f32 %v2128_v25, %v4486_v6 }
0x118d   :  { %2170 = vrot.lane.b32.xlu0 %v3443_v61, %s3540_s3  ;;  %v2129_v61 = vrot.slane %v4422_v10, 7  ;;  %v2147_v10 = vmul.f32 %v2131_v49, %v4494_v11 }
0x118e   :  { %2168 = vrot.lane.b32.xlu1 %v3445_v40, %s3540_s3 }
0x118f   :  { %v2145_v0 = vmul.f32 %v2129_v61, %v4489_v47 }
0x11f3   :  { %v2157_v16 = vpop.permute.xlu0 %2156 }
0x11f4   :  { %v2159_v45 = vpop.permute.xlu1 %2158  ;;  %v2180_v13 = vmul.f32 %v2157_v16, %v4471_v60 }
0x11f5   :  { %v2181_v20 = vmul.f32 %v2159_v45, %v4473_v17 }
0x11f6   :  { %2196 = vrot.lane.b32.xlu0 %v2180_v13, %s3541_s25  ;;  %v2146_v13 = vmul.f32 %v2130_v30, %v4497_v38 }
0x11f7   :  { %2198 = vrot.lane.b32.xlu1 %v2181_v20, %s3541_s25  ;;  %v2161_v7 = vpop.permute.xlu0 %2160 }
0x11f8   :  { %v2163_v59 = vpop.permute.xlu1 %2162  ;;  %v2182_v56 = vmul.f32 %v2161_v7, %v4478_v62 }
0x11f9   :  { %v2183_v3 = vmul.f32 %v2163_v59, %v4481_v14 }
0x11fa   :  { %2200 = vrot.lane.b32.xlu0 %v2182_v56, %s3541_s25 }
0x11fb   :  { %2202 = vrot.lane.b32.xlu1 %v2183_v3, %s3541_s25  ;;  %v2165_v34 = vpop.permute.xlu0 %2164 }
0x11fc   :  { %v2167_v31 = vpop.permute.xlu1 %2166  ;;  %v2184_v8 = vmul.f32 %v2165_v34, %v4486_v6 }
0x11fd   :  { %v2185_v37 = vmul.f32 %v2167_v31, %v4489_v47 }
0x11fe   :  { %2204 = vrot.lane.b32.xlu0 %v2184_v8, %s3541_s25 }
0x11ff   :  { %2206 = vrot.lane.b32.xlu1 %v2185_v37, %s3541_s25  ;;  %v2171_v55 = vpop.permute.xlu0 %2170 }
0x1200   :  { %v2169_v48 = vpop.permute.xlu1 %2168  ;;  %v2187_v33 = vmul.f32 %v2171_v55, %v4494_v11 }
0x1201   :  { %v2186_v54 = vmul.f32 %v2169_v48, %v4497_v38 }
0x1202   :  { %2210 = vrot.lane.b32.xlu0 %v2187_v33, %s3541_s25 }
0x1203   :  { %2208 = vrot.lane.b32.xlu1 %v2186_v54, %s3541_s25 }
0x1268   :  { %v2197_v19 = vpop.permute.xlu0 %2196 }
0x1269   :  { %v2199_v15 = vpop.permute.xlu1 %2198  ;;  %v4508_v23 = vadd.f32 %v2197_v19, %v2140_v22 }
0x126a   :  { %v4511_v1 = vadd.f32 %v2199_v15, %v2141_v52 }
0x126b   :  { %3446 = vtanh.f32 %v4508_v23 }
0x126c   :  { %3448 = vtanh.f32 %v4511_v1  ;;  %v2201_v4 = vpop.permute.xlu0 %2200 }
0x126d   :  { %v2203_v44 = vpop.permute.xlu1 %2202  ;;  %v4518_v28 = vadd.f32 %v2201_v4, %v2142_v53 }
0x126e   :  { %v4521_v40 = vadd.f32 %v2203_v44, %v2143_v5 }
0x126f   :  { %3450 = vtanh.f32 %v4518_v28 }
0x1270   :  { %3452 = vtanh.f32 %v4521_v40  ;;  %v2205_v51 = vpop.permute.xlu0 %2204 }
0x1271   :  { %v2207_v16 = vpop.permute.xlu1 %2206  ;;  %v4528_v12 = vadd.f32 %v2205_v51, %v2144_v9 }
0x1272   :  { %v4531_v45 = vadd.f32 %v2207_v16, %v2145_v0 }
0x1273   :  { %3454 = vtanh.f32 %v4528_v12 }
0x1274   :  { %3456 = vtanh.f32 %v4531_v45  ;;  %v2211_v20 = vpop.permute.xlu0 %2210 }
0x1275   :  { %v2209_v58 = vpop.permute.xlu1 %2208  ;;  %v4537_v7 = vadd.f32 %v2211_v20, %v2147_v10 }
0x1276   :  { %v4539_v43 = vadd.f32 %v2209_v58, %v2146_v13 }
0x1277   :  { %3458 = vtanh.f32 %v4537_v7 }
0x1278   :  { %v3447_v39 = vpop.eup %3446  ;;  %3460 = vtanh.f32 %v4539_v43 }
0x1279   :  { %v3449_v21 = vpop.eup %3448  ;;  %2244 = vrot.lane.b32.xlu0 %v3447_v39, %s3540_s3 }
0x127a   :  { %2246 = vrot.lane.b32.xlu1 %v3449_v21, %s3540_s3 }
0x127c   :  { %v3451_v59 = vpop.eup %3450 }
0x127d   :  { %v3453_v56 = vpop.eup %3452  ;;  %2248 = vrot.lane.b32.xlu0 %v3451_v59, %s3540_s3 }
0x127e   :  { %2250 = vrot.lane.b32.xlu1 %v3453_v56, %s3540_s3 }
0x1280   :  { %v3455_v3 = vpop.eup %3454 }
0x1281   :  { %v3457_v18 = vpop.eup %3456  ;;  %2252 = vrot.lane.b32.xlu0 %v3455_v3, %s3540_s3 }
0x1282   :  { %2254 = vrot.lane.b32.xlu1 %v3457_v18, %s3540_s3 }
0x1284   :  { %v3459_v34 = vpop.eup %3458 }
0x1285   :  { %v3461_v24 = vpop.eup %3460  ;;  %2258 = vrot.lane.b32.xlu0 %v3459_v34, %s3540_s3 }
0x1286   :  { %2256 = vrot.lane.b32.xlu1 %v3461_v24, %s3540_s3 }
0x12eb   :  { %v2245_v31 = vpop.permute.xlu0 %2244 }
0x12ec   :  { %v2247_v8 = vpop.permute.xlu1 %2246  ;;  %v2268_v37 = vmul.f32 %v2245_v31, %v4471_v60 }
0x12ed   :  { %v2269_v55 = vmul.f32 %v2247_v8, %v4473_v17 }
0x12ee   :  { %v2284_v33 = vrot.slane %v2268_v37, 6 }
0x12ef   :  { %v2285_v48 = vrot.slane %v2269_v55, 5  ;;  %v2249_v54 = vpop.permute.xlu0 %2248 }
0x12f0   :  { %v2251_v63 = vpop.permute.xlu1 %2250  ;;  %v2270_v32 = vmul.f32 %v2249_v54, %v4478_v62 }
0x12f1   :  { %v2271_v22 = vmul.f32 %v2251_v63, %v4481_v14  ;;  %v2286_v19 = vsel %vm454_vm2, %v2285_v48, %v2284_v33 }
0x12f2   :  { %v2287_v52 = vrot.slane %v2270_v32, 4 }
0x12f3   :  { %v2289_v57 = vrot.slane %v2271_v22, 3  ;;  %v2253_v15 = vpop.permute.xlu0 %2252 }
0x12f4   :  { %v2288_v27 = vsel %vm457_vm3, %v2287_v52, %v2286_v19  ;;  %v2255_v53 = vpop.permute.xlu1 %2254  ;;  %v2272_v60 = vmul.f32 %v2253_v15, %v4486_v6 }
0x12f5   :  { %v2273_v17 = vmul.f32 %v2255_v53, %v4489_v47  ;;  %v2290_v25 = vsel %vm460_vm4, %v2289_v57, %v2288_v27 }
0x12f6   :  { %v2291_v5 = vrot.slane %v2272_v60, 2 }
0x12f7   :  { %v2293_v4 = vrot.slane %v2273_v17, 1  ;;  %v2259_v44 = vpop.permute.xlu0 %2258 }
0x12f8   :  { %v2292_v62 = vsel %vm463_vm5, %v2291_v5, %v2290_v25  ;;  %v2257_v14 = vpop.permute.xlu1 %2256  ;;  %v2275_v61 = vmul.f32 %v2259_v44, %v4494_v11 }
0x12f9   :  { %v2274_v9 = vmul.f32 %v2257_v14, %v4497_v38  ;;  %v2294_v0 = vsel %vm466_vm6, %v2293_v4, %v2292_v62 }
0x12fa   :  { %v2296_v51 = vrot.slane %v2275_v61, 7 }
0x12fb   :  { %v2295_v49 = vsel %vm469_vm7, %v2274_v9, %v2294_v0 }
0x12fc   :  { %v2297_v6 = vsel %vm472_vm8, %v2296_v51, %v2295_v49 }
0x12fd   :  { %2298 = vrot.lane.b32.xlu0 %v2297_v6, %s3541_s25 }
0x136f   :  { %v2299_v47 = vpop.permute.xlu0 %2298 }
0x1370   :  { %3175 = vmatmul.mubr.msk.f32.vlgmr.msra.gmra.mxu1 %vm54_vm0, %v2299_v47 }
0x1371   :  { %3220 = vmatprep.mubr.msk.f32.mxu1 %vm3539_vm1, %v3538_v2 }
0x1430   :  { %v2368_v16 = vpop.f32.mrf.mxu1 }
0x1431   :  { %v2373_v30 = vrot.slane %v2368_v16, 1  ;;  %v2374_v11 = vrot.slane %v2368_v16, 2  ;;  %v2375_v10 = vrot.slane %v2368_v16, 3  ;;  %v2376_v38 = vrot.slane %v2368_v16, 4 }
0x1432   :  { %v3176_v13 = vpop.f32.mrf.mxu1  ;;  %v2377_v39 = vrot.slane %v2368_v16, 5  ;;  %v2378_v59 = vrot.slane %v2368_v16, 6  ;;  %v2379_v3 = vrot.slane %v2368_v16, 7 }
0x1433   :  { %v2388_v20 = vadd.f32 %v2373_v30, %v3697_v26  ;;  %v2389_v58 = vadd.f32 %v2374_v11, %v3703_v35  ;;  %v2390_v21 = vadd.f32 %v2375_v10, %v3709_v41  ;;  %v2391_v56 = vadd.f32 %v2376_v38, %v3699_v29 }
0x1434   :  { %v2392_v18 = vadd.f32 %v2377_v39, %v3715_v46  ;;  %v2393_v34 = vadd.f32 %v2378_v59, %v3705_v36  ;;  %v2394_v24 = vadd.f32 %v2379_v3, %v3718_v50  ;;  %v2395_v26 = vadd.f32 %v2368_v16, %v3711_v42 }
0x1435   :  { %3462 = vtanh.f32 %v2388_v20  ;;  %v2428_v11 = vrot.slane %v4508_v23, 7  ;;  %v2429_v10 = vrot.slane %v4511_v1, 7  ;;  %v2431_v59 = vrot.slane %v4521_v40, 7 }
0x1436   :  { %3464 = vtanh.f32 %v2389_v58  ;;  %v2430_v58 = vrot.slane %v4518_v28, 7  ;;  %v2432_v1 = vrot.slane %v4528_v12, 7 }
0x1437   :  { %3466 = vtanh.f32 %v2390_v21 }
0x1438   :  { %3468 = vtanh.f32 %v2391_v56 }
0x1439   :  { %3470 = vtanh.f32 %v2392_v18 }
0x143a   :  { %3472 = vtanh.f32 %v2393_v34 }
0x143b   :  { %3474 = vtanh.f32 %v2394_v24 }
0x143c   :  { %3476 = vtanh.f32 %v2395_v26  ;;  %v2433_v26 = vrot.slane %v4531_v45, 7 }
0x1442   :  { %v3463_v35 = vpop.eup %3462 }
0x1443   :  { %v3465_v41 = vpop.eup %3464  ;;  %2460 = vrot.lane.b32.xlu1 %v3463_v35, %s3540_s3  ;;  %v2404_v8 = vmul.f32 0.5, %v3463_v35 }
0x1444   :  { %2462 = vrot.lane.b32.xlu0 %v3465_v41, %s3540_s3  ;;  %v3467_v29 = vpop.eup %3466  ;;  %v2405_v37 = vmul.f32 0.5, %v3465_v41 }
0x1445   :  { %v3469_v46 = vpop.eup %3468  ;;  %v4586_v55 = vadd.f32 0.5, %v2404_v8  ;;  %v2406_v48 = vmul.f32 0.5, %v3467_v29 }
0x1446   :  { %v3471_v36 = vpop.eup %3470  ;;  %v4588_v33 = vadd.f32 0.5, %v2405_v37  ;;  %v2407_v63 = vmul.f32 0.5, %v3469_v46 }
0x1447   :  { %2464 = vrot.lane.b32.xlu1 %v3467_v29, %s3540_s3  ;;  %v3473_v50 = vpop.eup %3472  ;;  %v4593_v19 = vadd.f32 0.5, %v2406_v48  ;;  %v2408_v57 = vmul.f32 0.5, %v3471_v36  ;;  %v2444_v38 = vmul.f32 %v2428_v11, %v4586_v55  ;;  %v2434_v29 = vrot.slane %v4539_v43, 7 }
0x1448   :  { %2466 = vrot.lane.b32.xlu0 %v3469_v46, %s3540_s3  ;;  %v3475_v42 = vpop.eup %3474  ;;  %v4596_v15 = vadd.f32 0.5, %v2407_v63  ;;  %v2409_v53 = vmul.f32 0.5, %v3473_v50  ;;  %v2445_v13 = vmul.f32 %v2429_v10, %v4588_v33 }
0x1449   :  { %v3477_v31 = vpop.eup %3476  ;;  %v4601_v4 = vadd.f32 0.5, %v2408_v57  ;;  %v2410_v25 = vmul.f32 0.5, %v3475_v42  ;;  %v2446_v3 = vmul.f32 %v2430_v58, %v4593_v19 }
0x144a   :  { %v4604_v44 = vadd.f32 0.5, %v2409_v53  ;;  %v2411_v14 = vmul.f32 0.5, %v3477_v31  ;;  %v2447_v23 = vmul.f32 %v2431_v59, %v4596_v15  ;;  %v2631_v59 = vld [vmem:[%s4786_s4 + $0x18] sm:$0xff] }
0x144b   :  { %2468 = vrot.lane.b32.xlu1 %v3471_v36, %s3540_s3  ;;  %v4609_v51 = vadd.f32 0.5, %v2410_v25  ;;  %v2448_v28 = vmul.f32 %v2432_v1, %v4601_v4  ;;  %3178 = vmatpush3.msra.mxu0 %v2631_v59  ;;  %v2628_v1 = vld [vmem:[%s4786_s4] sm:$0xff]  ;;  %v2744_v59 = vld [vmem:[%s4787_s6 + $0x18] sm:$0xff] }
0x144c   :  { %2470 = vrot.lane.b32.xlu0 %v3473_v50, %s3540_s3  ;;  %v4612_v49 = vadd.f32 0.5, %v2411_v14  ;;  %v2449_v40 = vmul.f32 %v2433_v26, %v4604_v44  ;;  %v2435_v50 = vrot.slane %v4537_v7, 7  ;;  %3179 = vmatprep.subr.mxu0 %v3538_v2 }
0x144d   :  { %v2450_v12 = vmul.f32 %v2434_v29, %v4609_v51 }
0x144e   :  { %v2451_v45 = vmul.f32 %v2435_v50, %v4612_v49 }
0x144f   :  { %2472 = vrot.lane.b32.xlu1 %v3475_v42, %s3540_s3 }
0x1450   :  { %2474 = vrot.lane.b32.xlu0 %v3477_v31, %s3540_s3 }
0x14b5   :  { %v2461_v54 = vpop.permute.xlu1 %2460 }
0x14b6   :  { %v2463_v32 = vpop.permute.xlu0 %2462  ;;  %v2484_v22 = vmul.f32 %v2461_v54, %v4586_v55 }
0x14b7   :  { %v2485_v52 = vmul.f32 %v2463_v32, %v4588_v33 }
0x14b8   :  { %2500 = vrot.lane.b32.xlu1 %v2484_v22, %s3541_s25 }
0x14b9   :  { %2502 = vrot.lane.b32.xlu0 %v2485_v52, %s3541_s25  ;;  %v2465_v27 = vpop.permute.xlu1 %2464 }
0x14ba   :  { %v2467_v60 = vpop.permute.xlu0 %2466  ;;  %v2486_v17 = vmul.f32 %v2465_v27, %v4593_v19 }
0x14bb   :  { %v2487_v5 = vmul.f32 %v2467_v60, %v4596_v15 }
0x14bc   :  { %2504 = vrot.lane.b32.xlu1 %v2486_v17, %s3541_s25 }
0x14bd   :  { %2506 = vrot.lane.b32.xlu0 %v2487_v5, %s3541_s25  ;;  %v2469_v62 = vpop.permute.xlu1 %2468 }
0x14be   :  { %v2471_v61 = vpop.permute.xlu0 %2470  ;;  %v2488_v9 = vmul.f32 %v2469_v62, %v4601_v4 }
0x14bf   :  { %v2489_v0 = vmul.f32 %v2471_v61, %v4604_v44 }
0x14c0   :  { %2508 = vrot.lane.b32.xlu1 %v2488_v9, %s3541_s25 }
0x14c1   :  { %2510 = vrot.lane.b32.xlu0 %v2489_v0, %s3541_s25  ;;  %v2473_v6 = vpop.permute.xlu1 %2472 }
0x14c2   :  { %v2475_v47 = vpop.permute.xlu0 %2474  ;;  %v2490_v16 = vmul.f32 %v2473_v6, %v4609_v51 }
0x14c3   :  { %v2491_v30 = vmul.f32 %v2475_v47, %v4612_v49 }
0x14c4   :  { %2512 = vrot.lane.b32.xlu1 %v2490_v16, %s3541_s25 }
0x14c5   :  { %2514 = vrot.lane.b32.xlu0 %v2491_v30, %s3541_s25 }
0x152a   :  { %v2501_v20 = vpop.permute.xlu1 %2500 }
0x152b   :  { %v2503_v39 = vpop.permute.xlu0 %2502  ;;  %v2524_v21 = vadd.f32 %v2501_v20, %v2444_v38 }
0x152c   :  { %v2525_v56 = vadd.f32 %v2503_v39, %v2445_v13 }
0x152d   :  { %3478 = vtanh.f32 %v2524_v21 }
0x152e   :  { %3480 = vtanh.f32 %v2525_v56  ;;  %v2505_v18 = vpop.permute.xlu1 %2504 }
0x152f   :  { %v2507_v34 = vpop.permute.xlu0 %2506  ;;  %v2526_v24 = vadd.f32 %v2505_v18, %v2446_v3 }
0x1530   :  { %v2527_v35 = vadd.f32 %v2507_v34, %v2447_v23  ;;  %v2629_v23 = vld [vmem:[%s4786_s4 + $0x8] sm:$0xff] }
0x1531   :  { %3482 = vtanh.f32 %v2526_v24 }
0x1532   :  { %3484 = vtanh.f32 %v2527_v35  ;;  %v2509_v41 = vpop.permute.xlu1 %2508 }
0x1533   :  { %v2511_v46 = vpop.permute.xlu0 %2510  ;;  %v2528_v36 = vadd.f32 %v2509_v41, %v2448_v28 }
0x1534   :  { %v2529_v42 = vadd.f32 %v2511_v46, %v2449_v40 }
0x1535   :  { %3486 = vtanh.f32 %v2528_v36 }
0x1536   :  { %3488 = vtanh.f32 %v2529_v42  ;;  %v2513_v31 = vpop.permute.xlu1 %2512 }
0x1537   :  { %v2515_v8 = vpop.permute.xlu0 %2514  ;;  %v2530_v37 = vadd.f32 %v2513_v31, %v2450_v12 }
0x1538   :  { %v2531_v48 = vadd.f32 %v2515_v8, %v2451_v45 }
0x1539   :  { %3490 = vtanh.f32 %v2530_v37 }
0x153a   :  { %v3479_v54 = vpop.eup %3478  ;;  %3492 = vtanh.f32 %v2531_v48 }
0x153b   :  { %v3481_v63 = vpop.eup %3480  ;;  %2548 = vrot.lane.b32.xlu1 %v3479_v54, %s3540_s3 }
0x153c   :  { %2550 = vrot.lane.b32.xlu0 %v3481_v63, %s3540_s3 }
0x153e   :  { %v3483_v7 = vpop.eup %3482 }
0x153f   :  { %v3485_v43 = vpop.eup %3484  ;;  %2552 = vrot.lane.b32.xlu1 %v3483_v7, %s3540_s3 }
0x1540   :  { %2554 = vrot.lane.b32.xlu0 %v3485_v43, %s3540_s3 }
0x1542   :  { %v3487_v32 = vpop.eup %3486 }
0x1543   :  { %v3489_v22 = vpop.eup %3488  ;;  %2556 = vrot.lane.b32.xlu1 %v3487_v32, %s3540_s3 }
0x1544   :  { %2558 = vrot.lane.b32.xlu0 %v3489_v22, %s3540_s3 }
0x1546   :  { %v3491_v52 = vpop.eup %3490 }
0x1547   :  { %v3493_v57 = vpop.eup %3492  ;;  %2560 = vrot.lane.b32.xlu1 %v3491_v52, %s3540_s3 }
0x1548   :  { %2562 = vrot.lane.b32.xlu0 %v3493_v57, %s3540_s3 }
0x15ad   :  { %v2549_v27 = vpop.permute.xlu1 %2548 }
0x15ae   :  { %v2551_v53 = vpop.permute.xlu0 %2550  ;;  %v2572_v60 = vmul.f32 %v2549_v27, %v4586_v55 }
0x15af   :  { %v2573_v17 = vmul.f32 %v2551_v53, %v4588_v33 }
0x15b0   :  { %v2975_v5 = vmul.f32 -1.442695, %v2572_v60 }
0x15b1   :  { %v2976_v25 = vmul.f32 -1.442695, %v2573_v17  ;;  %v2553_v62 = vpop.permute.xlu1 %2552 }
0x15b2   :  { %3494 = vpow2.f32 %v2975_v5  ;;  %v2555_v14 = vpop.permute.xlu0 %2554  ;;  %v2574_v61 = vmul.f32 %v2553_v62, %v4593_v19 }
0x15b3   :  { %3496 = vpow2.f32 %v2976_v25  ;;  %v2575_v9 = vmul.f32 %v2555_v14, %v4596_v15 }
0x15b4   :  { %v2977_v0 = vmul.f32 -1.442695, %v2574_v61 }
0x15b5   :  { %v2978_v6 = vmul.f32 -1.442695, %v2575_v9  ;;  %v2557_v47 = vpop.permute.xlu1 %2556 }
0x15b6   :  { %3498 = vpow2.f32 %v2977_v0  ;;  %v2559_v16 = vpop.permute.xlu0 %2558  ;;  %v2576_v30 = vmul.f32 %v2557_v47, %v4601_v4 }
0x15b7   :  { %3500 = vpow2.f32 %v2978_v6  ;;  %v2577_v55 = vmul.f32 %v2559_v16, %v4604_v44 }
0x15b8   :  { %v2979_v33 = vmul.f32 -1.442695, %v2576_v30 }
0x15b9   :  { %v2980_v11 = vmul.f32 -1.442695, %v2577_v55  ;;  %v2561_v10 = vpop.permute.xlu1 %2560 }
0x15ba   :  { %3502 = vpow2.f32 %v2979_v33  ;;  %v2563_v38 = vpop.permute.xlu0 %2562  ;;  %v2578_v19 = vmul.f32 %v2561_v10, %v4609_v51  ;;  %v2630_v51 = vld [vmem:[%s4786_s4 + $0x10] sm:$0xff] }
0x15bb   :  { %3504 = vpow2.f32 %v2980_v11  ;;  %v2579_v15 = vmul.f32 %v2563_v38, %v4612_v49  ;;  %3180 = vmatpush3.msra.mxu0 %v2630_v51  ;;  %v2756_v11 = vld [vmem:[%s4787_s6 + $0x78] sm:$0xff]  ;;  %v2755_v10 = vld [vmem:[%s4787_s6 + $0x70] sm:$0xff]  ;;  %v2754_v38 = vld [vmem:[%s4787_s6 + $0x68] sm:$0xff] }
0x15bc   :  { %v2981_v13 = vmul.f32 -1.442695, %v2578_v19  ;;  %3181 = vmatprep.subr.mxu0 %v3538_v2  ;;  %3189 = vmatpush3.msra.mxu1 %v2756_v11  ;;  %v2753_v19 = vld [vmem:[%s4787_s6 + $0x60] sm:$0xff]  ;;  %v2743_v51 = vld [vmem:[%s4787_s6 + $0x10] sm:$0xff] }
0x15bd   :  { %v2982_v20 = vmul.f32 -1.442695, %v2579_v15  ;;  %3182 = vmatpush3.msra.mxu0 %v2629_v23  ;;  %3190 = vmatprep.subr.mxu1 %v3538_v2  ;;  %v2752_v15 = vld [vmem:[%s4787_s6 + $0x58] sm:$0xff] }
0x15be   :  { %3506 = vpow2.f32 %v2981_v13  ;;  %3183 = vmatprep.subr.mxu0 %v3538_v2  ;;  %3191 = vmatpush3.msra.mxu1 %v2755_v10  ;;  %v2751_v13 = vld [vmem:[%s4787_s6 + $0x50] sm:$0xff] }
0x15bf   :  { %v3495_v58 = vpop.eup %3494  ;;  %3508 = vpow2.f32 %v2982_v20  ;;  %3184 = vmatpush3.msra.mxu0 %v2628_v1  ;;  %3192 = vmatprep.subr.mxu1 %v3538_v2  ;;  %v2750_v20 = vld [vmem:[%s4787_s6 + $0x48] sm:$0xff] }
0x15c0   :  { %v3497_v39 = vpop.eup %3496  ;;  %v2604_v4 = vadd.f32 1.0, %v3495_v58  ;;  %3223 = vmatprep.subr.mxu0 %v3538_v2  ;;  %3193 = vmatpush3.msra.mxu1 %v2754_v38  ;;  %v2749_v58 = vld [vmem:[%s4787_s6 + $0x40] sm:$0xff] }
0x15c1   :  { %v2605_v21 = vadd.f32 1.0, %v3497_v39  ;;  %3194 = vmatprep.subr.mxu1 %v3538_v2  ;;  %v2748_v39 = vld [vmem:[%s4787_s6 + $0x38] sm:$0xff] }
0x15c2   :  { %3510 = vrcp.f32 %v2604_v4  ;;  %3195 = vmatpush3.msra.mxu1 %v2753_v19  ;;  %v2747_v4 = vld [vmem:[%s4787_s6 + $0x30] sm:$0xff] }
0x15c3   :  { %v3499_v44 = vpop.eup %3498  ;;  %3512 = vrcp.f32 %v2605_v21  ;;  %3196 = vmatprep.subr.mxu1 %v3538_v2  ;;  %v2746_v21 = vld [vmem:[%s4787_s6 + $0x28] sm:$0xff] }
0x15c4   :  { %v3501_v49 = vpop.eup %3500  ;;  %v2606_v56 = vadd.f32 1.0, %v3499_v44  ;;  %3197 = vmatpush3.msra.mxu1 %v2752_v15  ;;  %v2745_v44 = vld [vmem:[%s4787_s6 + $0x20] sm:$0xff] }
0x15c5   :  { %v2607_v3 = vadd.f32 1.0, %v3501_v49  ;;  %3198 = vmatprep.subr.mxu1 %v3538_v2  ;;  %v2742_v49 = vld [vmem:[%s4787_s6 + $0x8] sm:$0xff] }
0x15c6   :  { %3514 = vrcp.f32 %v2606_v56  ;;  %3199 = vmatpush3.msra.mxu1 %v2751_v13  ;;  %v2741_v56 = vld [vmem:[%s4787_s6] sm:$0xff] }
0x15c7   :  { %v3503_v18 = vpop.eup %3502  ;;  %3516 = vrcp.f32 %v2607_v3  ;;  %3200 = vmatprep.subr.mxu1 %v3538_v2  ;;  %v2983_v3 = vld [vmem:[%s4788_s5] ss:$0 sm:$0xff] }
0x15c8   :  { %v3505_v34 = vpop.eup %3504  ;;  %v2608_v24 = vadd.f32 1.0, %v3503_v18  ;;  %3201 = vmatpush3.msra.mxu1 %v2750_v20 }
0x15c9   :  { %v2609_v26 = vadd.f32 1.0, %v3505_v34  ;;  %3202 = vmatprep.subr.mxu1 %v3538_v2 }
0x15ca   :  { %3518 = vrcp.f32 %v2608_v24  ;;  %3203 = vmatpush3.msra.mxu1 %v2749_v58 }
0x15cb   :  { %v3507_v35 = vpop.eup %3506  ;;  %3520 = vrcp.f32 %v2609_v26  ;;  %3204 = vmatprep.subr.mxu1 %v3538_v2 }
0x15cc   :  { %v3509_v28 = vpop.eup %3508  ;;  %v2610_v40 = vadd.f32 1.0, %v3507_v35  ;;  %3205 = vmatpush3.msra.mxu1 %v2748_v39 }
0x15cd   :  { %v2611_v41 = vadd.f32 1.0, %v3509_v28  ;;  %3206 = vmatprep.subr.mxu1 %v3538_v2  ;;  %v2843_v28 = vld [vmem:[%s4789_s8 + $0x18] sm:$0xff] }
0x15ce   :  { %3522 = vrcp.f32 %v2610_v40  ;;  %3207 = vmatpush3.msra.mxu1 %v2747_v4  ;;  %v2842_v40 = vld [vmem:[%s4789_s8 + $0x10] sm:$0xff] }
0x15cf   :  { %v3511_v29 = vpop.eup %3510  ;;  %3524 = vrcp.f32 %v2611_v41  ;;  %3208 = vmatprep.subr.mxu1 %v3538_v2  ;;  %v2841_v41 = vld [vmem:[%s4789_s8 + $0x8] sm:$0xff] }
0x15d0   :  { %v3513_v46 = vpop.eup %3512  ;;  %2937 = vrot.lane.b32.xlu0 %v3511_v29, %s3541_s25  ;;  %v2647_v50 = vrot.slane %v3511_v29, 7  ;;  %3209 = vmatpush3.msra.mxu1 %v2746_v21  ;;  %v2840_v29 = vld [vmem:[%s4789_s8] sm:$0xff] }
0x15d1   :  { %v2648_v36 = vrot.slane %v3513_v46, 6  ;;  %v2924_v54 = vrot.slane %v3513_v46, 7  ;;  %3210 = vmatprep.subr.mxu1 %v3538_v2  ;;  %v2986_v46 = vld [vmem:[%s4790_s7] ss:$0 sm:$0xff] }
0x15d2   :  { %3211 = vmatpush3.msra.mxu1 %v2745_v44 }
0x15d3   :  { %v3515_v42 = vpop.eup %3514  ;;  %v2649_v8 = vsel %vm454_vm2, %v2648_v36, %v2647_v50  ;;  %3212 = vmatprep.subr.mxu1 %v3538_v2 }
0x15d4   :  { %v3517_v12 = vpop.eup %3516  ;;  %v2650_v45 = vrot.slane %v3515_v42, 5  ;;  %v2925_v31 = vrot.slane %v3515_v42, 6  ;;  %3213 = vmatpush3.msra.mxu1 %v2744_v59 }
0x15d5   :  { %v2652_v37 = vrot.slane %v3517_v12, 4  ;;  %v2927_v7 = vrot.slane %v3517_v12, 5  ;;  %3214 = vmatprep.subr.mxu1 %v3538_v2 }
0x15d6   :  { %v2651_v48 = vsel %vm457_vm3, %v2650_v45, %v2649_v8  ;;  %v2926_v22 = vsel %vm454_vm2, %v2925_v31, %v2924_v54  ;;  %3215 = vmatpush3.msra.mxu1 %v2743_v51 }
0x15d7   :  { %v3519_v63 = vpop.eup %3518  ;;  %v2653_v57 = vsel %vm460_vm4, %v2652_v37, %v2651_v48  ;;  %v2928_v17 = vsel %vm457_vm3, %v2927_v7, %v2926_v22  ;;  %3216 = vmatprep.subr.mxu1 %v3538_v2 }
0x15d8   :  { %v3521_v43 = vpop.eup %3520  ;;  %v2654_v32 = vrot.slane %v3519_v63, 3  ;;  %v2929_v52 = vrot.slane %v3519_v63, 4  ;;  %3217 = vmatpush3.msra.mxu1 %v2742_v49 }
0x15d9   :  { %v2656_v27 = vrot.slane %v3521_v43, 2  ;;  %v2931_v5 = vrot.slane %v3521_v43, 3  ;;  %3218 = vmatprep.subr.mxu1 %v3538_v2 }
0x15da   :  { %v2655_v53 = vsel %vm463_vm5, %v2654_v32, %v2653_v57  ;;  %v2930_v14 = vsel %vm460_vm4, %v2929_v52, %v2928_v17  ;;  %3219 = vmatpush3.msra.mxu1 %v2741_v56 }
0x15db   :  { %v3523_v60 = vpop.eup %3522  ;;  %v2657_v9 = vsel %vm466_vm6, %v2656_v27, %v2655_v53  ;;  %v2932_v47 = vsel %vm463_vm5, %v2931_v5, %v2930_v14 }
0x15dc   :  { %v3525_v25 = vpop.eup %3524  ;;  %v2658_v62 = vrot.slane %v3523_v60, 1  ;;  %v2933_v61 = vrot.slane %v3523_v60, 2 }
0x15dd   :  { %v2935_v16 = vrot.slane %v3525_v25, 1 }
0x15de   :  { %v2659_v0 = vsel %vm469_vm7, %v2658_v62, %v2657_v9  ;;  %v2934_v30 = vsel %vm466_vm6, %v2933_v61, %v2932_v47 }
0x15df   :  { %v2660_v6 = vsel %vm472_vm8, %v3525_v25, %v2659_v0  ;;  %v2936_v55 = vsel %vm469_vm7, %v2935_v16, %v2934_v30 }
0x15e0   :  { %2661 = vrot.lane.b32.xlu1 %v2660_v6, %s3541_s25 }
0x15e4   :  { %2939 = vrot.lane.b32.xlu1 %v2936_v55, %s3541_s25 }
0x1642   :  { %v2938_v7 = vpop.permute.xlu0 %2937 }
0x1652   :  { %v2662_v33 = vpop.permute.xlu1 %2661 }
0x1653   :  { %3186 = vmatmul.mubr.msk.f32.vlgmr.msra.gmra.mxu0 %vm54_vm0, %v2662_v33 }
0x1654   :  { %3231 = vmatprep.mubr.msk.f32.mxu0 %vm3539_vm1, %v3538_v2  ;;  %3224 = vmatpush3.msra.mxu0 %v2843_v28 }
0x1655   :  { %3225 = vmatprep.subr.mxu0 %v3538_v2 }
0x1656   :  { %3226 = vmatpush3.msra.mxu0 %v2842_v40  ;;  %v2940_v43 = vpop.permute.xlu1 %2939 }
0x1657   :  { %3227 = vmatprep.subr.mxu0 %v3538_v2 }
0x1658   :  { %3228 = vmatpush3.msra.mxu0 %v2841_v41 }
0x1659   :  { %3229 = vmatprep.subr.mxu0 %v3538_v2  ;;  %v2988_v2 = vld [vmem:[%s4791_s9] ss:$0 sm:$0xff] }
0x165a   :  { %3230 = vmatpush3.msra.mxu0 %v2840_v29 }
0x1713   :  { %v2731_v23 = vpop.f32.mrf.mxu0 }
0x1714   :  { %v2732_v18 = vadd.f32 %v2983_v3, %v2731_v23 }
0x1715   :  { %v3187_v1 = vpop.f32.mrf.mxu0 }
0x1716   :  { %v2985_v34 = vmul.f32 -1.442695, %v2732_v18 }
0x1718   :  { %3526 = vpow2.f32 %v2985_v34 }
0x1725   :  { %v3527_v24 = vpop.eup %3526 }
0x1726   :  { %v2738_v26 = vadd.f32 1.0, %v3527_v24 }
0x1728   :  { %3528 = vrcp.f32 %v2738_v26 }
0x1735   :  { %v3529_v35 = vpop.eup %3528 }
0x1736   :  { %3221 = vmatmul.mubr.f32.vlgmr.msra.gmra.mxu1 %v3529_v35 }
0x17f6   :  { %v2830_v36 = vpop.f32.mrf.mxu1 }
0x17f7   :  { %v2831_v50 = vadd.f32 %v2986_v46, %v2830_v36 }
0x17f8   :  { %v3222_v42 = vpop.f32.mrf.mxu1 }
0x17f9   :  { %v2987_v12 = vmul.f32 -1.442695, %v2831_v50 }
0x17fb   :  { %3530 = vpow2.f32 %v2987_v12 }
0x1808   :  { %v3531_v45 = vpop.eup %3530 }
0x1809   :  { %v2837_v31 = vadd.f32 1.0, %v3531_v45 }
0x180b   :  { %3532 = vrcp.f32 %v2837_v31 }
0x1818   :  { %v3533_v8 = vpop.eup %3532 }
0x1819   :  { %3232 = vmatmul.mubr.msk.f32.vlgmr.msra.gmra.mxu0 %vm54_vm0, %v3533_v8 }
0x18d9   :  { %v2920_v37 = vpop.f32.mrf.mxu0 }
0x18da   :  { %v2921_v48 = vadd.f32 %v2988_v2, %v2920_v37 }
0x18db   :  { %v3233_v54 = vpop.f32.mrf.mxu0 }
0x18dc   :  { %v2944_v63 = vrot.slane %v2921_v48, 1 }
0x18de   :  { %2945 = vrot.lane.b32.xlu0 %v2944_v63, %s3541_s25 }
0x1950   :  { %v2946_v32 = vpop.permute.xlu0 %2945 }
0x1951   :  { %v2948_v22 = vsel %vm54_vm0, %v2938_v7, %v2946_v32  ;;  %v2949_v52 = vsel %vm54_vm0, %v2940_v43, %v2946_v32 }
0x1952   :  { %v2951_v57 = vsel %vm2950_vm9, %v2948_v22, 0.0  ;;  %v2952_v27 = vsel %vm2950_vm9, %v2949_v52, 0.0 }
0x1953   :  { %2953 = vst [vmem:[%s4792_s10 - $0x7] sm:$0x80] %v2951_v57  ;;  %2954 = vst [vmem:[%s4792_s10 + $0x1] sm:$0x7f] %v2952_v27 }

</bundles_post_ra>
